<compile_context>
chip_gen: v7x
topology: tpu7x:2x2x1
jax: 0.10.0
libtpu: 0.0.40
codegen_flags: <defaults>
</compile_context>

<pallas_src>
import functools

import jax
import jax.numpy as jnp
from jax import lax
from jax.experimental import pallas as pl
from jax.experimental.pallas import tpu as pltpu


def _attention_weights_kernel(x_ref, wq_ref, bq_ref, wk_ref, bk_ref, out_ref,
                              *, block_batch, matmul_dtype):
    bb = block_batch
    n = out_ref.shape[-1]

    x = x_ref[...]                                   # (Bb*N, F) f32
    xm = x.astype(matmul_dtype)
    wq = wq_ref[...].astype(matmul_dtype)            # (F, F)
    wk = wk_ref[...].astype(matmul_dtype)

    # Fused projections over all Bb batches at once: (Bb*N, F) @ (F, F).
    # Bias add + relu in f32.
    q = jnp.dot(xm, wq, preferred_element_type=jnp.float32) + bq_ref[...]
    k = jnp.dot(xm, wk, preferred_element_type=jnp.float32) + bk_ref[...]
    q = jnp.maximum(q, 0.0)
    k = jnp.maximum(k, 0.0)

    # Fold the 1/sqrt(d_head) scale into Q (relu(x)*s == relu(x*s)-equivalent
    # placement after the activation, matching scores/sqrt(d) exactly).
    d_head = wq_ref.shape[1]
    q = q * (1.0 / jnp.sqrt(jnp.float32(d_head)))

    f = q.shape[-1]
    q3 = q.reshape(bb, n, f).astype(matmul_dtype)    # (Bb, N, F)
    k3 = k.reshape(bb, n, f).astype(matmul_dtype)

    # Batched Q @ K^T without materializing a transposed K:
    # contract last dims, batch over dim 0 -> (Bb, N, N), f32 accumulation.
    scores = lax.dot_general(
        q3, k3,
        dimension_numbers=(((2,), (2,)), ((0,), (0,))),
        preferred_element_type=jnp.float32)

    # sigmoid on the EUP: exp + approximate reciprocal.
    w = pl.reciprocal(1.0 + jnp.exp(-scores), approx=True)

    # zero_and_symmetrize: 0.5*(W + W^T) per batch, zero the self-loop diagonal.
    w = 0.5 * (w + jnp.swapaxes(w, -1, -2))
    row = lax.broadcasted_iota(jnp.int32, (bb, n, n), 1)
    col = lax.broadcasted_iota(jnp.int32, (bb, n, n), 2)
    w = jnp.where(row == col, jnp.float32(0.0), w)

    out_ref[...] = w.astype(out_ref.dtype)


def _choose_block_batch(B, N, target_rows=512):
    """Largest divisor Bb of B with Bb*N <= target_rows; keep >=2 grid steps
    when possible so both v7x TensorCores get work."""
    bb = 1
    for d in range(1, B + 1):
        if B % d == 0 and d * N <= target_rows:
            bb = d
    if bb == B and B > 1:
        divisors = [d for d in range(1, B) if B % d == 0]
        if divisors:
            bb = divisors[-1]
    return bb


def attention_weights(x, wq, bq, wk, bk, *, block_batch=None,
                      matmul_dtype=jnp.bfloat16):
    """x: (B, N, F) float32 -> symmetric zero-diagonal weights (B, N, N)."""
    B, N, F = x.shape
    bb = _choose_block_batch(B, N) if block_batch is None else block_batch
    assert B % bb == 0, f"block_batch {bb} must divide batch {B}"
    grid = (B // bb,)

    # Flatten (B, N, F) -> (B*N, F) so each grid step gets one lane-friendly
    # (Bb*N, F) slab for the fused projection matmuls.
    x2 = x.reshape(B * N, F)

    kernel = functools.partial(
        _attention_weights_kernel, block_batch=bb, matmul_dtype=matmul_dtype)

    return pl.pallas_call(
        kernel,
        out_shape=jax.ShapeDtypeStruct((B, N, N), jnp.float32),
        grid_spec=pltpu.PrefetchScalarGridSpec(
            num_scalar_prefetch=0,
            grid=grid,
            in_specs=[
                pl.BlockSpec((bb * N, F), lambda b: (b, 0)),   # X rows per step
                pl.BlockSpec((F, F), lambda b: (0, 0)),        # Wq (constant idx)
                pl.BlockSpec((1, F), lambda b: (0, 0)),        # bq
                pl.BlockSpec((F, F), lambda b: (0, 0)),        # Wk
                pl.BlockSpec((1, F), lambda b: (0, 0)),        # bk
            ],
            out_specs=pl.BlockSpec((bb, N, N), lambda b: (b, 0, 0)),
        ),
        compiler_params=pltpu.CompilerParams(
            dimension_semantics=("parallel",)),
    )(x2, wq, bq, wk, bk)


def _init_linear(key, fan_in, fan_out):
    # torch.nn.Linear default init: U(-1/sqrt(fan_in), 1/sqrt(fan_in))
    kw, kb = jax.random.split(key)
    bound = 1.0 / jnp.sqrt(jnp.float32(fan_in))
    w = jax.random.uniform(kw, (fan_in, fan_out), jnp.float32, -bound, bound)
    b = jax.random.uniform(kb, (1, fan_out), jnp.float32, -bound, bound)
    return w, b


def reference(x, wq, bq, wk, bk):
    q = jnp.maximum(jnp.einsum("bnf,fg->bng", x, wq) + bq, 0.0)
    k = jnp.maximum(jnp.einsum("bnf,fg->bng", x, wk) + bk, 0.0)
    s = jnp.einsum("bnd,bmd->bnm", q, k) / jnp.sqrt(jnp.float32(wq.shape[1]))
    w = jax.nn.sigmoid(s)
    w = 0.5 * (w + jnp.swapaxes(w, -1, -2))
    n = w.shape[-1]
    return w * (1.0 - jnp.eye(n, dtype=w.dtype))[None]


if __name__ == "__main__":
    B, N, F = 32, 16, 32      # 32 graphs, 16 nodes, 32-dim node features
    root = jax.random.PRNGKey(0)
    kx, kq, kk = jax.random.split(root, 3)

    x = jax.random.normal(kx, (B, N, F), jnp.float32)
    wq, bq = _init_linear(kq, F, F)
    wk, bk = _init_linear(kk, F, F)

    ref = reference(x, wq, bq, wk, bk)

    # Default fast path: bf16 MXU operands, f32 accumulation.
    out = jax.block_until_ready(attention_weights(x, wq, bq, wk, bk))
    assert out.shape == (B, N, N)
    assert jnp.allclose(out, ref, atol=5e-2, rtol=5e-2)
    # symmetric with zero diagonal (enforced exactly in f32 post-matmul)
    assert jnp.allclose(out, jnp.swapaxes(out, -1, -2), atol=1e-6)
    assert jnp.allclose(jnp.diagonal(out, axis1=-2, axis2=-1), 0.0)

    # f32 MXU path for a tighter numerical check.
    out32 = jax.block_until_ready(
        attention_weights(x, wq, bq, wk, bk, matmul_dtype=jnp.float32))
    assert jnp.allclose(out32, ref, atol=1e-2, rtol=1e-2)
    assert jnp.allclose(out32, jnp.swapaxes(out32, -1, -2), atol=1e-6)
    assert jnp.allclose(jnp.diagonal(out32, axis1=-2, axis2=-1), 0.0)

    print("KERNEL_OK")
</pallas_src>

<mosaic_0001>
module attributes {stable_mosaic.version = 11 : i64} {
  func.func @_attention_weights_kernel(%arg0: i32, %arg1: memref<256x32xf32, #tpu.memory_space<vmem>>, %arg2: memref<32x32xf32, #tpu.memory_space<vmem>>, %arg3: memref<1x32xf32, #tpu.memory_space<vmem>>, %arg4: memref<32x32xf32, #tpu.memory_space<vmem>>, %arg5: memref<1x32xf32, #tpu.memory_space<vmem>>, %arg6: memref<16x16x16xf32, #tpu.memory_space<vmem>>) attributes {dimension_semantics = [#tpu.dimension_semantics<parallel>], iteration_bounds = array<i64: 2>, scalar_prefetch = 0 : i64, scratch_operands = 0 : i64, tpu.core_type = #tpu.core_type<tc>, window_params = [{transform_indices = @transform_0, window_bounds = array<i64: 256, 32>}, {pipeline_mode = #tpu.pipeline_mode<synchronous>, transform_indices = @transform_1, window_bounds = array<i64: 32, 32>}, {pipeline_mode = #tpu.pipeline_mode<synchronous>, transform_indices = @transform_2, window_bounds = array<i64: 1, 32>}, {pipeline_mode = #tpu.pipeline_mode<synchronous>, transform_indices = @transform_3, window_bounds = array<i64: 32, 32>}, {pipeline_mode = #tpu.pipeline_mode<synchronous>, transform_indices = @transform_4, window_bounds = array<i64: 1, 32>}, {transform_indices = @transform_5, window_bounds = array<i64: 16, 16, 16>}]} {
    %c0 = arith.constant 0 : index
    %c0_0 = arith.constant 0 : index
    %0 = vector.load %arg1[%c0, %c0_0] : memref<256x32xf32, #tpu.memory_space<vmem>>, vector<256x32xf32>
    %1 = arith.truncf %0 : vector<256x32xf32> to vector<256x32xbf16>
    %c0_1 = arith.constant 0 : index
    %c0_2 = arith.constant 0 : index
    %2 = vector.load %arg2[%c0_1, %c0_2] : memref<32x32xf32, #tpu.memory_space<vmem>>, vector<32x32xf32>
    %3 = arith.truncf %2 : vector<32x32xf32> to vector<32x32xbf16>
    %c0_3 = arith.constant 0 : index
    %c0_4 = arith.constant 0 : index
    %4 = vector.load %arg4[%c0_3, %c0_4] : memref<32x32xf32, #tpu.memory_space<vmem>>, vector<32x32xf32>
    %5 = arith.truncf %4 : vector<32x32xf32> to vector<32x32xbf16>
    %cst = arith.constant dense<0.000000e+00> : vector<256x32xf32>
    %6 = tpu.matmul %1, %3, %cst {dimension_numbers = #tpu.dot_dimension_numbers<[1], [0], [0], [1], [0, 0, 1, 1], [], []>} : vector<256x32xbf16>, vector<32x32xbf16>, vector<256x32xf32> -> vector<256x32xf32>
    %c0_5 = arith.constant 0 : index
    %c0_6 = arith.constant 0 : index
    %7 = vector.load %arg3[%c0_5, %c0_6] : memref<1x32xf32, #tpu.memory_space<vmem>>, vector<1x32xf32>
    %8 = vector.broadcast %7 : vector<1x32xf32> to vector<256x32xf32>
    %9 = arith.addf %6, %8 : vector<256x32xf32>
    %cst_7 = arith.constant dense<0.000000e+00> : vector<256x32xf32>
    %10 = tpu.matmul %1, %5, %cst_7 {dimension_numbers = #tpu.dot_dimension_numbers<[1], [0], [0], [1], [0, 0, 1, 1], [], []>} : vector<256x32xbf16>, vector<32x32xbf16>, vector<256x32xf32> -> vector<256x32xf32>
    %c0_8 = arith.constant 0 : index
    %c0_9 = arith.constant 0 : index
    %11 = vector.load %arg5[%c0_8, %c0_9] : memref<1x32xf32, #tpu.memory_space<vmem>>, vector<1x32xf32>
    %12 = vector.broadcast %11 : vector<1x32xf32> to vector<256x32xf32>
    %13 = arith.addf %10, %12 : vector<256x32xf32>
    %cst_10 = arith.constant 0.000000e+00 : f32
    %14 = vector.broadcast %cst_10 : f32 to vector<256x32xf32>
    %15 = arith.maximumf %9, %14 : vector<256x32xf32>
    %cst_11 = arith.constant 0.000000e+00 : f32
    %16 = vector.broadcast %cst_11 : f32 to vector<256x32xf32>
    %17 = arith.maximumf %13, %16 : vector<256x32xf32>
    %cst_12 = arith.constant 3.200000e+01 : f32
    %18 = math.sqrt %cst_12 : f32
    %cst_13 = arith.constant 1.000000e+00 : f32
    %19 = arith.divf %cst_13, %18 : f32
    %20 = vector.broadcast %19 : f32 to vector<256x32xf32>
    %21 = arith.mulf %15, %20 : vector<256x32xf32>
    %22 = vector.shape_cast %21 : vector<256x32xf32> to vector<16x16x32xf32>
    %23 = arith.truncf %22 : vector<16x16x32xf32> to vector<16x16x32xbf16>
    %24 = vector.shape_cast %17 : vector<256x32xf32> to vector<16x16x32xf32>
    %25 = arith.truncf %24 : vector<16x16x32xf32> to vector<16x16x32xbf16>
    %cst_14 = arith.constant dense<0.000000e+00> : vector<16x16x16xf32>
    %26 = tpu.matmul %23, %25, %cst_14 {dimension_numbers = #tpu.dot_dimension_numbers<[2], [2], [1], [1], [0, 0, 0, 1, 1, 1], [0], [0]>} : vector<16x16x32xbf16>, vector<16x16x32xbf16>, vector<16x16x16xf32> -> vector<16x16x16xf32>
    %cst_15 = arith.constant 0.000000e+00 : f32
    %27 = vector.broadcast %cst_15 : f32 to vector<16x16x16xf32>
    %28 = arith.subf %27, %26 : vector<16x16x16xf32>
    %29 = math.exp %28 : vector<16x16x16xf32>
    %cst_16 = arith.constant 1.000000e+00 : f32
    %30 = vector.broadcast %cst_16 : f32 to vector<16x16x16xf32>
    %31 = arith.addf %30, %29 : vector<16x16x16xf32>
    %32 = tpu.reciprocal %31 {approx = true} : vector<16x16x16xf32> -> vector<16x16x16xf32>
    %33 = tpu.transpose %32, [0, 2, 1] : vector<16x16x16xf32> -> vector<16x16x16xf32>
    %34 = arith.addf %32, %33 : vector<16x16x16xf32>
    %cst_17 = arith.constant 5.000000e-01 : f32
    %35 = vector.broadcast %cst_17 : f32 to vector<16x16x16xf32>
    %36 = arith.mulf %35, %34 : vector<16x16x16xf32>
    %37 = tpu.iota {dimensions = array<i32: 1>} : vector<16x16x16xi32>
    %38 = tpu.iota {dimensions = array<i32: 2>} : vector<16x16x16xi32>
    %39 = arith.cmpi eq, %37, %38 : vector<16x16x16xi32>
    %cst_18 = arith.constant 0.000000e+00 : f32
    %40 = vector.broadcast %cst_18 : f32 to vector<16x16x16xf32>
    %41 = arith.select %39, %40, %36 : vector<16x16x16xi1>, vector<16x16x16xf32>
    %c0_19 = arith.constant 0 : index
    %c0_20 = arith.constant 0 : index
    %c0_21 = arith.constant 0 : index
    %42 = vector.load %arg6[%c0_19, %c0_20, %c0_21] : memref<16x16x16xf32, #tpu.memory_space<vmem>>, vector<16x16x16xf32>
    tpu.vector_store %arg6[%c0_19, %c0_20, %c0_21], %41 {strides = array<i32>} : memref<16x16x16xf32, #tpu.memory_space<vmem>>, vector<16x16x16xf32>,
    return
  }
  func.func @transform_0(%arg0: i32) -> (i32, i32) {
    %c0_i32 = arith.constant 0 : i32
    %c0_i32_0 = arith.constant 0 : i32
    return %arg0, %c0_i32 : i32, i32
  }
  func.func @transform_1(%arg0: i32) -> (i32, i32) {
    %c0_i32 = arith.constant 0 : i32
    %c0_i32_0 = arith.constant 0 : i32
    %c0_i32_1 = arith.constant 0 : i32
    return %c0_i32, %c0_i32_0 : i32, i32
  }
  func.func @transform_2(%arg0: i32) -> (i32, i32) {
    %c0_i32 = arith.constant 0 : i32
    %c0_i32_0 = arith.constant 0 : i32
    %c0_i32_1 = arith.constant 0 : i32
    return %c0_i32, %c0_i32_0 : i32, i32
  }
  func.func @transform_3(%arg0: i32) -> (i32, i32) {
    %c0_i32 = arith.constant 0 : i32
    %c0_i32_0 = arith.constant 0 : i32
    %c0_i32_1 = arith.constant 0 : i32
    return %c0_i32, %c0_i32_0 : i32, i32
  }
  func.func @transform_4(%arg0: i32) -> (i32, i32) {
    %c0_i32 = arith.constant 0 : i32
    %c0_i32_0 = arith.constant 0 : i32
    %c0_i32_1 = arith.constant 0 : i32
    return %c0_i32, %c0_i32_0 : i32, i32
  }
  func.func @transform_5(%arg0: i32) -> (i32, i32, i32) {
    %c0_i32 = arith.constant 0 : i32
    %c0_i32_0 = arith.constant 0 : i32
    %c0_i32_1 = arith.constant 0 : i32
    return %arg0, %c0_i32, %c0_i32_0 : i32, i32, i32
  }
}

</mosaic_0001>

<bundles_post_ra>
// kernel: tpu_custom_call.1
= control target key start
LH: loop header
LB: loop body
LE: loop exit
PB: predicated region body
PF: predicated region fallthrough
CT: control target
= control target key end

     0   :  { %s2899_s18 = smov 0   ;;  %s3430_s0 = inlined_call_operand.vmem [shape: f32[512,32], index: 0, kind: input, shape index: {}]   ;;  %s3431_s1 = inlined_call_operand.vmem [shape: f32[32,32], index: 1, kind: input, shape index: {}]   ;;  %s3432_s2 = inlined_call_operand.vmem [shape: f32[1,32], index: 2, kind: input, shape index: {}]   ;;  %s3433_s3 = inlined_call_operand.vmem [shape: f32[32,32], index: 3, kind: input, shape index: {}]   ;;  %s3434_s4 = inlined_call_operand.vmem [shape: f32[1,32], index: 4, kind: input, shape index: {}]   ;;  %s3435_s5 = inlined_call_operand.vmem [shape: f32[32,16,16], index: 5, kind: output, shape index: {}]  }
   0x1 LB: > { %s2422_s19 = sadd.s32 4294967295, %s2865_s18   ;;  %p2426_p0 = scmp.ge.s32.totalorder %s2865_s18, 1  ;;  %s2865_s18 = sphi %s2899_s18, %s15_s18  }
   0x2   : > { %p188_p1 = scmp.lt.s32.totalorder %s2865_s18, 3 }
   0x4   : > { %p189_p2 = pnand %p2426_p0, %p188_p1 }
   0x5   : > { %v285_v0 = vld [vmem:[%s3433_s3] sm:$0xff] (!%p189_p2)  ;;  %v286_v1 = vld [vmem:[%s3433_s3 + $0x8] sm:$0xff] (!%p189_p2)  ;;  %v287_v2 = vld [vmem:[%s3433_s3 + $0x10] sm:$0xff] (!%p189_p2)  ;;  %s2427_s26 = sshll.u32 (!%p189_p2), %s2422_s19, 5  ;;  %vm298_vm0 = vcmask (!%p189_p2), 261120   ;;  %v2867_v60 = vmov (!%p189_p2), 0.0  }
   0x6   : > { %192 = sbr.rel (%p189_p2) target bundleno = 689 (0x2b1), region = 40  ;;  %v289_v3 = vpack.c.bf16 (!%p189_p2), %v286_v1, %v285_v0  ;;  %v288_v4 = vld [vmem:[%s3433_s3 + $0x18] sm:$0xff] (!%p189_p2)  ;;  %v279_v5 = vld [vmem:[%s3431_s1] sm:$0xff] (!%p189_p2)  ;;  %v280_v6 = vld [vmem:[%s3431_s1 + $0x8] sm:$0xff] (!%p189_p2)  ;;  %p218_p3 = scmp.lt.s32.totalorder (!%p189_p2), %s2427_s26, 63  ;;  %vm2868_vm1 = vmmov (!%p189_p2), 0  }
   0x7   : > { %v290_v7 = vpack.c.bf16 (!%p189_p2), %v288_v4, %v287_v2  ;;  %v283_v8 = vpack.c.bf16 (!%p189_p2), %v280_v6, %v279_v5  ;;  %v281_v9 = vld [vmem:[%s3431_s1 + $0x10] sm:$0xff] (!%p189_p2)  ;;  %v282_v10 = vld [vmem:[%s3431_s1 + $0x18] sm:$0xff] (!%p189_p2)  ;;  %v3011_v61 = vld [vmem:[%s3434_s4] ss:$0 sm:$0xff] (!%p189_p2)  ;;  %s2429_s22 = sshll.u32 (!%p189_p2), %s2422_s19, 4  ;;  %vm2331_vm3 = vcmask (!%p189_p2), 130048  }
   0x8   : > { %2589 = vmatprep.subr.bf16.mxu1 (!%p189_p2), %v289_v3  ;;  %v284_v11 = vpack.c.bf16 (!%p189_p2), %v282_v10, %v281_v9  ;;  %v3016_v62 = vld [vmem:[%s3432_s2] ss:$0 sm:$0xff] (!%p189_p2)  ;;  %p224_p4 = scmp.lt.s32.totalorder (!%p189_p2), %s2429_s22, 31 }
   0x9   : > { %2590 = vmatpush3.bf16.msra.mxu1 (!%p189_p2), %v289_v3  ;;  %2553 = vmatprep.subr.bf16.mxu0 (!%p189_p2), %v283_v8 }
   0xa   : > { %2591 = vmatprep.subr.bf16.mxu1 (!%p189_p2), %v290_v7  ;;  %2554 = vmatpush3.bf16.msra.mxu0 (!%p189_p2), %v283_v8 }
   0xb   : > { %2555 = vmatprep.subr.bf16.mxu0 (!%p189_p2), %v284_v11 }
   0xd   : > { %s3441_s26 = smov (!%p218_p3, %s2427_s26), 63  ;;  %2592 = vmatpush3.bf16.msra.mxu1 %v290_v7  ;;  %s3443_s22 = smov (!%p224_p4, %s2429_s22), 31 }
   0xe   : > { %s2428_s12 = sshll.u32 %s3441_s26, 3  ;;  %2556 = vmatpush3.bf16.msra.mxu0 %v284_v11  ;;  %2631 = vmatprep.subr.bf16.mxu1 %v2867_v60  ;;  %s2484_s23 = sshll.u32 %s3443_s22, 4 }
   0xf   : > { %s2936_s15 = scalar_lea.vmem %s3430_s0, %s2428_s12  ;;  %2625 = vmatprep.subr.bf16.mxu0 %v2867_v60  ;;  %s3263_s19 = scalar_lea.vmem %s3435_s5, %s2484_s23 }
  0x10   : > { %v231_v12 = vld [vmem:[%s2936_s15] sm:$0xff]  ;;  %v232_v13 = vld [vmem:[%s2936_s15 + $0x8] sm:$0xff]  ;;  %v233_v14 = vld [vmem:[%s2936_s15 + $0x10] sm:$0xff] }
  0x11   : > { %v263_v15 = vpack.c.bf16 %v232_v13, %v231_v12  ;;  %v234_v16 = vld [vmem:[%s2936_s15 + $0x18] sm:$0xff]  ;;  %v235_v17 = vld [vmem:[%s2936_s15 + $0x20] sm:$0xff]  ;;  %v236_v18 = vld [vmem:[%s2936_s15 + $0x28] sm:$0xff] }
  0x12   : > { %v264_v19 = vpack.c.bf16 %v234_v16, %v233_v14  ;;  %v265_v20 = vpack.c.bf16 %v236_v18, %v235_v17  ;;  %v237_v21 = vld [vmem:[%s2936_s15 + $0x30] sm:$0xff]  ;;  %v238_v22 = vld [vmem:[%s2936_s15 + $0x38] sm:$0xff]  ;;  %v239_v23 = vld [vmem:[%s2936_s15 + $0x40] sm:$0xff] }
  0x13   : > { %2593 = vmatprep.mubr.msk.bf16.mxu1 %vm298_vm0, %v263_v15  ;;  %2557 = vmatprep.mubr.msk.bf16.mxu0 %vm298_vm0, %v263_v15  ;;  %v240_v24 = vld [vmem:[%s2936_s15 + $0x48] sm:$0xff]  ;;  %v266_v25 = vpack.c.bf16 %v238_v22, %v237_v21  ;;  %v241_v27 = vld [vmem:[%s2936_s15 + $0x50] sm:$0xff]  ;;  %v242_v28 = vld [vmem:[%s2936_s15 + $0x58] sm:$0xff] }
  0x14   : > { %2594 = vmatmul.mubr.msk.bf16.vlgmr.msra.gmra.mrb[0].mxu1 %vm298_vm0, %v264_v19  ;;  %2558 = vmatmul.mubr.msk.bf16.vlgmr.msra.gmra.mrb[0].mxu0 %vm298_vm0, %v264_v19  ;;  %v267_v26 = vpack.c.bf16 %v240_v24, %v239_v23  ;;  %v243_v29 = vld [vmem:[%s2936_s15 + $0x60] sm:$0xff]  ;;  %v244_v30 = vld [vmem:[%s2936_s15 + $0x68] sm:$0xff]  ;;  %v268_v31 = vpack.c.bf16 %v242_v28, %v241_v27  ;;  %v245_v33 = vld [vmem:[%s2936_s15 + $0x70] sm:$0xff] }
  0x15   : > { %2597 = vmatprep.mubr.msk.bf16.mxu1 %vm298_vm0, %v265_v20  ;;  %2561 = vmatprep.mubr.msk.bf16.mxu0 %vm298_vm0, %v265_v20  ;;  %v269_v32 = vpack.c.bf16 %v244_v30, %v243_v29  ;;  %v246_v34 = vld [vmem:[%s2936_s15 + $0x78] sm:$0xff]  ;;  %v247_v35 = vld [vmem:[%s2936_s15 + $0x80] sm:$0xff]  ;;  %v248_v36 = vld [vmem:[%s2936_s15 + $0x88] sm:$0xff] }
  0x16   : > { %v270_v37 = vpack.c.bf16 %v246_v34, %v245_v33  ;;  %v271_v38 = vpack.c.bf16 %v248_v36, %v247_v35  ;;  %v249_v39 = vld [vmem:[%s2936_s15 + $0x90] sm:$0xff]  ;;  %v250_v40 = vld [vmem:[%s2936_s15 + $0x98] sm:$0xff]  ;;  %v251_v41 = vld [vmem:[%s2936_s15 + $0xa0] sm:$0xff] }
  0x17   : > { %v252_v42 = vld [vmem:[%s2936_s15 + $0xa8] sm:$0xff]  ;;  %v272_v43 = vpack.c.bf16 %v250_v40, %v249_v39  ;;  %v253_v45 = vld [vmem:[%s2936_s15 + $0xb0] sm:$0xff]  ;;  %v254_v46 = vld [vmem:[%s2936_s15 + $0xb8] sm:$0xff] }
  0x18   : > { %v273_v44 = vpack.c.bf16 %v252_v42, %v251_v41  ;;  %v255_v47 = vld [vmem:[%s2936_s15 + $0xc0] sm:$0xff]  ;;  %v256_v48 = vld [vmem:[%s2936_s15 + $0xc8] sm:$0xff]  ;;  %v274_v49 = vpack.c.bf16 %v254_v46, %v253_v45  ;;  %v257_v51 = vld [vmem:[%s2936_s15 + $0xd0] sm:$0xff] }
  0x19   : > { %v275_v50 = vpack.c.bf16 %v256_v48, %v255_v47  ;;  %v258_v52 = vld [vmem:[%s2936_s15 + $0xd8] sm:$0xff]  ;;  %v259_v53 = vld [vmem:[%s2936_s15 + $0xe0] sm:$0xff]  ;;  %v260_v54 = vld [vmem:[%s2936_s15 + $0xe8] sm:$0xff] }
  0x1a   : > { %v276_v55 = vpack.c.bf16 %v258_v52, %v257_v51  ;;  %v277_v56 = vpack.c.bf16 %v260_v54, %v259_v53  ;;  %v261_v57 = vld [vmem:[%s2936_s15 + $0xf0] sm:$0xff]  ;;  %v262_v58 = vld [vmem:[%s2936_s15 + $0xf8] sm:$0xff] }
  0x1b   : > { %v278_v59 = vpack.c.bf16 %v262_v58, %v261_v57 }
  0x1c   : > { %2598 = vmatmul.mubr.msk.bf16.gmra.mrb[4].mxu1 %vm298_vm0, %v266_v25  ;;  %2562 = vmatmul.mubr.msk.bf16.gmra.mrb[4].mxu0 %vm298_vm0, %v266_v25 }
  0x1d   : > { %2601 = vmatprep.mubr.msk.bf16.mxu1 %vm298_vm0, %v267_v26  ;;  %2565 = vmatprep.mubr.msk.bf16.mxu0 %vm298_vm0, %v267_v26 }
  0x24   : > { %2602 = vmatmul.mubr.msk.bf16.gmra.mrb[8].mxu1 %vm298_vm0, %v268_v31  ;;  %2566 = vmatmul.mubr.msk.bf16.gmra.mrb[8].mxu0 %vm298_vm0, %v268_v31 }
  0x25   : > { %2605 = vmatprep.mubr.msk.bf16.mxu1 %vm298_vm0, %v269_v32  ;;  %2569 = vmatprep.mubr.msk.bf16.mxu0 %vm298_vm0, %v269_v32 }
  0x2c   : > { %2606 = vmatmul.mubr.msk.bf16.gmra.mrb[12].mxu1 %vm298_vm0, %v270_v37  ;;  %2570 = vmatmul.mubr.msk.bf16.gmra.mrb[12].mxu0 %vm298_vm0, %v270_v37 }
  0x2d   : > { %2609 = vmatprep.mubr.msk.bf16.mxu1 %vm298_vm0, %v271_v38  ;;  %2573 = vmatprep.mubr.msk.bf16.mxu0 %vm298_vm0, %v271_v38 }
  0x34   : > { %2610 = vmatmul.mubr.msk.bf16.gmra.mrb[16].mxu1 %vm298_vm0, %v272_v43  ;;  %2574 = vmatmul.mubr.msk.bf16.gmra.mrb[16].mxu0 %vm298_vm0, %v272_v43 }
  0x35   : > { %2613 = vmatprep.mubr.msk.bf16.mxu1 %vm298_vm0, %v273_v44  ;;  %2577 = vmatprep.mubr.msk.bf16.mxu0 %vm298_vm0, %v273_v44 }
  0x3c   : > { %2614 = vmatmul.mubr.msk.bf16.gmra.mrb[20].mxu1 %vm298_vm0, %v274_v49  ;;  %2578 = vmatmul.mubr.msk.bf16.gmra.mrb[20].mxu0 %vm298_vm0, %v274_v49 }
  0x3d   : > { %2617 = vmatprep.mubr.msk.bf16.mxu1 %vm298_vm0, %v275_v50  ;;  %2581 = vmatprep.mubr.msk.bf16.mxu0 %vm298_vm0, %v275_v50 }
  0x44   : > { %2618 = vmatmul.mubr.msk.bf16.gmra.mrb[24].mxu1 %vm298_vm0, %v276_v55  ;;  %2582 = vmatmul.mubr.msk.bf16.gmra.mrb[24].mxu0 %vm298_vm0, %v276_v55 }
  0x45   : > { %2621 = vmatprep.mubr.msk.bf16.mxu1 %vm298_vm0, %v277_v56  ;;  %2585 = vmatprep.mubr.msk.bf16.mxu0 %vm298_vm0, %v277_v56 }
  0x4c   : > { %2622 = vmatmul.mubr.msk.bf16.gmra.mrb[28].mxu1 %vm298_vm0, %v278_v59  ;;  %2586 = vmatmul.mubr.msk.bf16.gmra.mrb[28].mxu0 %vm298_vm0, %v278_v59 }
  0x4d   : > { %2633 = vmatprep.mubr.msk.bf16.mxu1 %vm2868_vm1, %v2867_v60  ;;  %2627 = vmatprep.mubr.msk.bf16.mxu0 %vm2868_vm1, %v2867_v60 }
  0xe7   : > { %v2595_v63 = vpop.f32.mrb[0].mxu1  ;;  %v2559_v2 = vpop.f32.mrb[0].mxu0 }
  0xe8   : > { %v558_v0 = vadd.f32 %v2595_v63, %v3011_v61  ;;  %v549_v1 = vpop.f32.mrb[1].mxu1  ;;  %v390_v5 = vadd.f32 %v2559_v2, %v3016_v62  ;;  %v381_v6 = vpop.f32.mrb[1].mxu0 }
  0xe9   : > { %v550_v3 = vadd.f32 %v3011_v61, %v549_v1  ;;  %v2596_v4 = vpop.f32.mrb[2].mxu1  ;;  %v382_v9 = vadd.f32 %v3016_v62, %v381_v6  ;;  %v2560_v10 = vpop.f32.mrb[2].mxu0 }
  0xea   : > { %v561_v7 = vadd.f32 %v2596_v4, %v3011_v61  ;;  %v552_v8 = vpop.f32.mrb[3].mxu1  ;;  %v678_v12 = vmax.f32 %v390_v5, 0.0  ;;  %v393_v13 = vadd.f32 %v2560_v10, %v3016_v62  ;;  %v384_v14 = vpop.f32.mrb[3].mxu0  ;;  %v710_v15 = vmax.f32 %v558_v0, 0.0 }
  0xeb   : > { %v553_v11 = vadd.f32 %v3011_v61, %v552_v8  ;;  %v676_v17 = vmax.f32 %v382_v9, 0.0  ;;  %v385_v18 = vadd.f32 %v3016_v62, %v384_v14  ;;  %v708_v19 = vmax.f32 %v550_v3, 0.0 }
  0xec   : > { %v711_v16 = vmax.f32 %v561_v7, 0.0  ;;  %v742_v21 = vmul.f32 0.17677669, %v678_v12  ;;  %v679_v22 = vmax.f32 %v393_v13, 0.0 }
  0xed   : > { %v709_v20 = vmax.f32 %v553_v11, 0.0  ;;  %v740_v24 = vmul.f32 0.17677669, %v676_v17  ;;  %v677_v25 = vmax.f32 %v385_v18, 0.0 }
  0xee   : > { %v789_v23 = vpack.c.bf16 %v711_v16, %v710_v15  ;;  %v743_v27 = vmul.f32 0.17677669, %v679_v22 }
  0xef   : > { %v788_v26 = vpack.c.bf16 %v709_v20, %v708_v19  ;;  %v2599_v28 = vpop.f32.mrb[4].mxu1  ;;  %v741_v30 = vmul.f32 0.17677669, %v677_v25  ;;  %v2563_v33 = vpop.f32.mrb[4].mxu0 }
  0xf0   : > { %v574_v29 = vadd.f32 %v2599_v28, %v3011_v61  ;;  %v565_v31 = vpop.f32.mrb[5].mxu1  ;;  %v855_v32 = vsel %vm298_vm0, %v789_v23, 0  ;;  %v773_v34 = vpack.c.bf16 %v743_v27, %v742_v21  ;;  %v406_v38 = vadd.f32 %v2563_v33, %v3016_v62  ;;  %v397_v39 = vpop.f32.mrb[5].mxu0 }
  0xf1   : > { %v566_v35 = vadd.f32 %v3011_v61, %v565_v31  ;;  %v2600_v36 = vpop.f32.mrb[6].mxu1  ;;  %2632 = vmatpush3.bf16.xpose.msra.mxu1 %v855_v32  ;;  %v808_v37 = vsel %vm298_vm0, %v788_v26, 0  ;;  %v772_v40 = vpack.c.bf16 %v741_v30, %v740_v24  ;;  %v398_v43 = vadd.f32 %v3016_v62, %v397_v39  ;;  %v2564_v44 = vpop.f32.mrb[6].mxu0 }
  0xf2   : > { %v577_v41 = vadd.f32 %v2600_v36, %v3011_v61  ;;  %v568_v42 = vpop.f32.mrb[7].mxu1  ;;  %2626 = vmatpush3.bf16.xpose.msra.mxu0 %v808_v37  ;;  %2643 = vmatprep.subr.bf16.mxu1 %v2867_v60  ;;  %v682_v46 = vmax.f32 %v406_v38, 0.0  ;;  %v409_v47 = vadd.f32 %v2564_v44, %v3016_v62  ;;  %v400_v48 = vpop.f32.mrb[7].mxu0  ;;  %v714_v49 = vmax.f32 %v574_v29, 0.0 }
  0xf3   : > { %v569_v45 = vadd.f32 %v3011_v61, %v568_v42  ;;  %2637 = vmatprep.subr.bf16.mxu0 %v2867_v60  ;;  %v680_v51 = vmax.f32 %v398_v43, 0.0  ;;  %v401_v52 = vadd.f32 %v3016_v62, %v400_v48  ;;  %v712_v53 = vmax.f32 %v566_v35, 0.0 }
  0xf4   : > { %v715_v50 = vmax.f32 %v577_v41, 0.0  ;;  %v746_v55 = vmul.f32 0.17677669, %v682_v46  ;;  %v683_v56 = vmax.f32 %v409_v47, 0.0 }
  0xf5   : > { %v713_v54 = vmax.f32 %v569_v45, 0.0  ;;  %v744_v58 = vmul.f32 0.17677669, %v680_v51  ;;  %v681_v59 = vmax.f32 %v401_v52, 0.0 }
  0xf6   : > { %v791_v57 = vpack.c.bf16 %v715_v50, %v714_v49  ;;  %v747_v0 = vmul.f32 0.17677669, %v683_v56 }
  0xf7   : > { %v790_v63 = vpack.c.bf16 %v713_v54, %v712_v53  ;;  %v2603_v1 = vpop.f32.mrb[8].mxu1  ;;  %v745_v3 = vmul.f32 0.17677669, %v681_v59  ;;  %v2567_v6 = vpop.f32.mrb[8].mxu0 }
  0xf8   : > { %v590_v2 = vadd.f32 %v2603_v1, %v3011_v61  ;;  %v581_v4 = vpop.f32.mrb[9].mxu1  ;;  %2634 = vmatmul.mubr.msk.bf16.vlgmr.msra.gmra.mrb[32].mxu1 %vm298_vm0, %v773_v34  ;;  %v949_v5 = vsel %vm298_vm0, %v791_v57, 0  ;;  %v775_v7 = vpack.c.bf16 %v747_v0, %v746_v55  ;;  %v422_v11 = vadd.f32 %v2567_v6, %v3016_v62  ;;  %v413_v12 = vpop.f32.mrb[9].mxu0 }
  0xf9   : > { %v582_v8 = vadd.f32 %v3011_v61, %v581_v4  ;;  %v2604_v9 = vpop.f32.mrb[10].mxu1  ;;  %2628 = vmatmul.mubr.msk.bf16.vlgmr.msra.gmra.mrb[32].mxu0 %vm298_vm0, %v772_v40  ;;  %2644 = vmatpush3.bf16.xpose.msra.mxu1 %v949_v5  ;;  %v902_v10 = vsel %vm298_vm0, %v790_v63, 0  ;;  %v774_v13 = vpack.c.bf16 %v745_v3, %v744_v58  ;;  %v414_v16 = vadd.f32 %v3016_v62, %v413_v12  ;;  %v2568_v17 = vpop.f32.mrb[10].mxu0 }
  0xfa   : > { %v593_v14 = vadd.f32 %v2604_v9, %v3011_v61  ;;  %v584_v15 = vpop.f32.mrb[11].mxu1  ;;  %2638 = vmatpush3.bf16.xpose.msra.mxu0 %v902_v10  ;;  %2645 = vmatprep.mubr.msk.bf16.mxu1 %vm2868_vm1, %v2867_v60  ;;  %v686_v19 = vmax.f32 %v422_v11, 0.0  ;;  %v425_v20 = vadd.f32 %v2568_v17, %v3016_v62  ;;  %v416_v21 = vpop.f32.mrb[11].mxu0  ;;  %v718_v22 = vmax.f32 %v590_v2, 0.0 }
  0xfb   : > { %v585_v18 = vadd.f32 %v3011_v61, %v584_v15  ;;  %2639 = vmatprep.mubr.msk.bf16.mxu0 %vm2868_vm1, %v2867_v60  ;;  %2655 = vmatprep.subr.bf16.mxu1 %v2867_v60  ;;  %v684_v24 = vmax.f32 %v414_v16, 0.0  ;;  %v417_v25 = vadd.f32 %v3016_v62, %v416_v21  ;;  %v716_v26 = vmax.f32 %v582_v8, 0.0 }
  0xfc   : > { %v719_v23 = vmax.f32 %v593_v14, 0.0  ;;  %2649 = vmatprep.subr.bf16.mxu0 %v2867_v60  ;;  %v750_v28 = vmul.f32 0.17677669, %v686_v19  ;;  %v687_v29 = vmax.f32 %v425_v20, 0.0 }
  0xfd   : > { %v717_v27 = vmax.f32 %v585_v18, 0.0  ;;  %v748_v31 = vmul.f32 0.17677669, %v684_v24  ;;  %v685_v32 = vmax.f32 %v417_v25, 0.0 }
  0xfe   : > { %v793_v30 = vpack.c.bf16 %v719_v23, %v718_v22  ;;  %v751_v34 = vmul.f32 0.17677669, %v687_v29 }
  0xff   : > { %v792_v33 = vpack.c.bf16 %v717_v27, %v716_v26  ;;  %v2607_v35 = vpop.f32.mrb[12].mxu1  ;;  %v749_v37 = vmul.f32 0.17677669, %v685_v32  ;;  %v2571_v40 = vpop.f32.mrb[12].mxu0 }
 0x100   : > { %v606_v36 = vadd.f32 %v2607_v35, %v3011_v61  ;;  %v597_v38 = vpop.f32.mrb[13].mxu1  ;;  %2646 = vmatmul.mubr.msk.bf16.vlgmr.msra.gmra.mrb[36].mxu1 %vm298_vm0, %v775_v7  ;;  %v1043_v39 = vsel %vm298_vm0, %v793_v30, 0  ;;  %v777_v41 = vpack.c.bf16 %v751_v34, %v750_v28  ;;  %v438_v45 = vadd.f32 %v2571_v40, %v3016_v62  ;;  %v429_v46 = vpop.f32.mrb[13].mxu0 }
 0x101   : > { %v598_v42 = vadd.f32 %v3011_v61, %v597_v38  ;;  %v2608_v43 = vpop.f32.mrb[14].mxu1  ;;  %2640 = vmatmul.mubr.msk.bf16.vlgmr.msra.gmra.mrb[36].mxu0 %vm298_vm0, %v774_v13  ;;  %2656 = vmatpush3.bf16.xpose.msra.mxu1 %v1043_v39  ;;  %v996_v44 = vsel %vm298_vm0, %v792_v33, 0  ;;  %v776_v47 = vpack.c.bf16 %v749_v37, %v748_v31  ;;  %v430_v50 = vadd.f32 %v3016_v62, %v429_v46  ;;  %v2572_v51 = vpop.f32.mrb[14].mxu0 }
 0x102   : > { %v609_v48 = vadd.f32 %v2608_v43, %v3011_v61  ;;  %v600_v49 = vpop.f32.mrb[15].mxu1  ;;  %2650 = vmatpush3.bf16.xpose.msra.mxu0 %v996_v44  ;;  %2657 = vmatprep.mubr.msk.bf16.mxu1 %vm2868_vm1, %v2867_v60  ;;  %v690_v53 = vmax.f32 %v438_v45, 0.0  ;;  %v441_v54 = vadd.f32 %v2572_v51, %v3016_v62  ;;  %v432_v55 = vpop.f32.mrb[15].mxu0  ;;  %v722_v56 = vmax.f32 %v606_v36, 0.0 }
 0x103   : > { %v601_v52 = vadd.f32 %v3011_v61, %v600_v49  ;;  %2651 = vmatprep.mubr.msk.bf16.mxu0 %vm2868_vm1, %v2867_v60  ;;  %2667 = vmatprep.subr.bf16.mxu1 %v2867_v60  ;;  %v688_v58 = vmax.f32 %v430_v50, 0.0  ;;  %v433_v59 = vadd.f32 %v3016_v62, %v432_v55  ;;  %v720_v63 = vmax.f32 %v598_v42, 0.0 }
 0x104   : > { %v723_v57 = vmax.f32 %v609_v48, 0.0  ;;  %2661 = vmatprep.subr.bf16.mxu0 %v2867_v60  ;;  %v754_v1 = vmul.f32 0.17677669, %v690_v53  ;;  %v691_v2 = vmax.f32 %v441_v54, 0.0 }
 0x105   : > { %v721_v0 = vmax.f32 %v601_v52, 0.0  ;;  %v752_v4 = vmul.f32 0.17677669, %v688_v58  ;;  %v689_v5 = vmax.f32 %v433_v59, 0.0 }
 0x106   : > { %v795_v3 = vpack.c.bf16 %v723_v57, %v722_v56  ;;  %v755_v7 = vmul.f32 0.17677669, %v691_v2 }
 0x107   : > { %v794_v6 = vpack.c.bf16 %v721_v0, %v720_v63  ;;  %v2611_v8 = vpop.f32.mrb[16].mxu1  ;;  %v753_v10 = vmul.f32 0.17677669, %v689_v5  ;;  %v2575_v13 = vpop.f32.mrb[16].mxu0 }
 0x108   : > { %v622_v9 = vadd.f32 %v2611_v8, %v3011_v61  ;;  %v613_v11 = vpop.f32.mrb[17].mxu1  ;;  %2658 = vmatmul.mubr.msk.bf16.vlgmr.msra.gmra.mrb[40].mxu1 %vm298_vm0, %v777_v41  ;;  %v1137_v12 = vsel %vm298_vm0, %v795_v3, 0  ;;  %v779_v14 = vpack.c.bf16 %v755_v7, %v754_v1  ;;  %v454_v18 = vadd.f32 %v2575_v13, %v3016_v62  ;;  %v445_v19 = vpop.f32.mrb[17].mxu0 }
 0x109   : > { %v614_v15 = vadd.f32 %v3011_v61, %v613_v11  ;;  %v2612_v16 = vpop.f32.mrb[18].mxu1  ;;  %2652 = vmatmul.mubr.msk.bf16.vlgmr.msra.gmra.mrb[40].mxu0 %vm298_vm0, %v776_v47  ;;  %2668 = vmatpush3.bf16.xpose.msra.mxu1 %v1137_v12  ;;  %v1090_v17 = vsel %vm298_vm0, %v794_v6, 0  ;;  %v778_v20 = vpack.c.bf16 %v753_v10, %v752_v4  ;;  %v446_v23 = vadd.f32 %v3016_v62, %v445_v19  ;;  %v2576_v24 = vpop.f32.mrb[18].mxu0 }
 0x10a   : > { %v625_v21 = vadd.f32 %v2612_v16, %v3011_v61  ;;  %v616_v22 = vpop.f32.mrb[19].mxu1  ;;  %2662 = vmatpush3.bf16.xpose.msra.mxu0 %v1090_v17  ;;  %2669 = vmatprep.mubr.msk.bf16.mxu1 %vm2868_vm1, %v2867_v60  ;;  %v694_v26 = vmax.f32 %v454_v18, 0.0  ;;  %v457_v27 = vadd.f32 %v2576_v24, %v3016_v62  ;;  %v448_v28 = vpop.f32.mrb[19].mxu0  ;;  %v726_v29 = vmax.f32 %v622_v9, 0.0 }
 0x10b   : > { %v617_v25 = vadd.f32 %v3011_v61, %v616_v22  ;;  %2663 = vmatprep.mubr.msk.bf16.mxu0 %vm2868_vm1, %v2867_v60  ;;  %2679 = vmatprep.subr.bf16.mxu1 %v2867_v60  ;;  %v692_v31 = vmax.f32 %v446_v23, 0.0  ;;  %v449_v32 = vadd.f32 %v3016_v62, %v448_v28  ;;  %v724_v33 = vmax.f32 %v614_v15, 0.0 }
 0x10c   : > { %v727_v30 = vmax.f32 %v625_v21, 0.0  ;;  %2673 = vmatprep.subr.bf16.mxu0 %v2867_v60  ;;  %v758_v35 = vmul.f32 0.17677669, %v694_v26  ;;  %v695_v36 = vmax.f32 %v457_v27, 0.0 }
 0x10d   : > { %v725_v34 = vmax.f32 %v617_v25, 0.0  ;;  %v756_v38 = vmul.f32 0.17677669, %v692_v31  ;;  %v693_v39 = vmax.f32 %v449_v32, 0.0 }
 0x10e   : > { %v797_v37 = vpack.c.bf16 %v727_v30, %v726_v29  ;;  %v759_v41 = vmul.f32 0.17677669, %v695_v36 }
 0x10f   : > { %v796_v40 = vpack.c.bf16 %v725_v34, %v724_v33  ;;  %v2615_v42 = vpop.f32.mrb[20].mxu1  ;;  %v757_v44 = vmul.f32 0.17677669, %v693_v39  ;;  %v2579_v47 = vpop.f32.mrb[20].mxu0 }
 0x110   : > { %v638_v43 = vadd.f32 %v2615_v42, %v3011_v61  ;;  %v629_v45 = vpop.f32.mrb[21].mxu1  ;;  %2670 = vmatmul.mubr.msk.bf16.vlgmr.msra.gmra.mrb[44].mxu1 %vm298_vm0, %v779_v14  ;;  %v1231_v46 = vsel %vm298_vm0, %v797_v37, 0  ;;  %v781_v48 = vpack.c.bf16 %v759_v41, %v758_v35  ;;  %v470_v52 = vadd.f32 %v2579_v47, %v3016_v62  ;;  %v461_v53 = vpop.f32.mrb[21].mxu0 }
 0x111   : > { %v630_v49 = vadd.f32 %v3011_v61, %v629_v45  ;;  %v2616_v50 = vpop.f32.mrb[22].mxu1  ;;  %2664 = vmatmul.mubr.msk.bf16.vlgmr.msra.gmra.mrb[44].mxu0 %vm298_vm0, %v778_v20  ;;  %2680 = vmatpush3.bf16.xpose.msra.mxu1 %v1231_v46  ;;  %v1184_v51 = vsel %vm298_vm0, %v796_v40, 0  ;;  %v780_v54 = vpack.c.bf16 %v757_v44, %v756_v38  ;;  %v462_v57 = vadd.f32 %v3016_v62, %v461_v53  ;;  %v2580_v58 = vpop.f32.mrb[22].mxu0 }
 0x112   : > { %v641_v55 = vadd.f32 %v2616_v50, %v3011_v61  ;;  %v632_v56 = vpop.f32.mrb[23].mxu1  ;;  %2674 = vmatpush3.bf16.xpose.msra.mxu0 %v1184_v51  ;;  %2681 = vmatprep.mubr.msk.bf16.mxu1 %vm2868_vm1, %v2867_v60  ;;  %v698_v63 = vmax.f32 %v470_v52, 0.0  ;;  %v473_v0 = vadd.f32 %v2580_v58, %v3016_v62  ;;  %v464_v1 = vpop.f32.mrb[23].mxu0  ;;  %v730_v2 = vmax.f32 %v638_v43, 0.0 }
 0x113   : > { %v633_v59 = vadd.f32 %v3011_v61, %v632_v56  ;;  %2675 = vmatprep.mubr.msk.bf16.mxu0 %vm2868_vm1, %v2867_v60  ;;  %2691 = vmatprep.subr.bf16.mxu1 %v2867_v60  ;;  %v696_v4 = vmax.f32 %v462_v57, 0.0  ;;  %v465_v5 = vadd.f32 %v3016_v62, %v464_v1  ;;  %v728_v6 = vmax.f32 %v630_v49, 0.0 }
 0x114   : > { %v731_v3 = vmax.f32 %v641_v55, 0.0  ;;  %2685 = vmatprep.subr.bf16.mxu0 %v2867_v60  ;;  %v762_v8 = vmul.f32 0.17677669, %v698_v63  ;;  %v699_v9 = vmax.f32 %v473_v0, 0.0 }
 0x115   : > { %v729_v7 = vmax.f32 %v633_v59, 0.0  ;;  %v760_v11 = vmul.f32 0.17677669, %v696_v4  ;;  %v697_v12 = vmax.f32 %v465_v5, 0.0 }
 0x116   : > { %v799_v10 = vpack.c.bf16 %v731_v3, %v730_v2  ;;  %v763_v14 = vmul.f32 0.17677669, %v699_v9 }
 0x117   : > { %v798_v13 = vpack.c.bf16 %v729_v7, %v728_v6  ;;  %v2619_v15 = vpop.f32.mrb[24].mxu1  ;;  %v761_v17 = vmul.f32 0.17677669, %v697_v12  ;;  %v2583_v20 = vpop.f32.mrb[24].mxu0 }
 0x118   : > { %v654_v16 = vadd.f32 %v2619_v15, %v3011_v61  ;;  %v645_v18 = vpop.f32.mrb[25].mxu1  ;;  %2682 = vmatmul.mubr.msk.bf16.vlgmr.msra.gmra.mrb[48].mxu1 %vm298_vm0, %v781_v48  ;;  %v1325_v19 = vsel %vm298_vm0, %v799_v10, 0  ;;  %v783_v21 = vpack.c.bf16 %v763_v14, %v762_v8  ;;  %v486_v25 = vadd.f32 %v2583_v20, %v3016_v62  ;;  %v477_v26 = vpop.f32.mrb[25].mxu0 }
 0x119   : > { %v646_v22 = vadd.f32 %v3011_v61, %v645_v18  ;;  %v2620_v23 = vpop.f32.mrb[26].mxu1  ;;  %2676 = vmatmul.mubr.msk.bf16.vlgmr.msra.gmra.mrb[48].mxu0 %vm298_vm0, %v780_v54  ;;  %2692 = vmatpush3.bf16.xpose.msra.mxu1 %v1325_v19  ;;  %v1278_v24 = vsel %vm298_vm0, %v798_v13, 0  ;;  %v782_v27 = vpack.c.bf16 %v761_v17, %v760_v11  ;;  %v478_v30 = vadd.f32 %v3016_v62, %v477_v26  ;;  %v2584_v31 = vpop.f32.mrb[26].mxu0 }
 0x11a   : > { %v657_v28 = vadd.f32 %v2620_v23, %v3011_v61  ;;  %v648_v29 = vpop.f32.mrb[27].mxu1  ;;  %2686 = vmatpush3.bf16.xpose.msra.mxu0 %v1278_v24  ;;  %2693 = vmatprep.mubr.msk.bf16.mxu1 %vm2868_vm1, %v2867_v60  ;;  %v702_v33 = vmax.f32 %v486_v25, 0.0  ;;  %v489_v34 = vadd.f32 %v2584_v31, %v3016_v62  ;;  %v480_v35 = vpop.f32.mrb[27].mxu0  ;;  %v734_v36 = vmax.f32 %v654_v16, 0.0 }
 0x11b   : > { %v649_v32 = vadd.f32 %v3011_v61, %v648_v29  ;;  %2687 = vmatprep.mubr.msk.bf16.mxu0 %vm2868_vm1, %v2867_v60  ;;  %2703 = vmatprep.subr.bf16.mxu1 %v2867_v60  ;;  %v700_v38 = vmax.f32 %v478_v30, 0.0  ;;  %v481_v39 = vadd.f32 %v3016_v62, %v480_v35  ;;  %v732_v40 = vmax.f32 %v646_v22, 0.0 }
 0x11c   : > { %v735_v37 = vmax.f32 %v657_v28, 0.0  ;;  %2697 = vmatprep.subr.bf16.mxu0 %v2867_v60  ;;  %v766_v42 = vmul.f32 0.17677669, %v702_v33  ;;  %v703_v43 = vmax.f32 %v489_v34, 0.0 }
 0x11d   : > { %v733_v41 = vmax.f32 %v649_v32, 0.0  ;;  %v764_v45 = vmul.f32 0.17677669, %v700_v38  ;;  %v701_v46 = vmax.f32 %v481_v39, 0.0 }
 0x11e   : > { %v801_v44 = vpack.c.bf16 %v735_v37, %v734_v36  ;;  %v767_v48 = vmul.f32 0.17677669, %v703_v43 }
 0x11f   : > { %v800_v47 = vpack.c.bf16 %v733_v41, %v732_v40  ;;  %v2623_v49 = vpop.f32.mrb[28].mxu1  ;;  %v765_v51 = vmul.f32 0.17677669, %v701_v46  ;;  %v2587_v54 = vpop.f32.mrb[28].mxu0 }
 0x120   : > { %v670_v50 = vadd.f32 %v2623_v49, %v3011_v61  ;;  %v661_v52 = vpop.f32.mrb[29].mxu1  ;;  %2694 = vmatmul.mubr.msk.bf16.vlgmr.msra.gmra.mrb[52].mxu1 %vm298_vm0, %v783_v21  ;;  %v1419_v53 = vsel %vm298_vm0, %v801_v44, 0  ;;  %v785_v55 = vpack.c.bf16 %v767_v48, %v766_v42  ;;  %v502_v59 = vadd.f32 %v2587_v54, %v3016_v62  ;;  %v493_v63 = vpop.f32.mrb[29].mxu0 }
 0x121   : > { %v662_v56 = vadd.f32 %v3011_v61, %v661_v52  ;;  %v2624_v57 = vpop.f32.mrb[30].mxu1  ;;  %2688 = vmatmul.mubr.msk.bf16.vlgmr.msra.gmra.mrb[52].mxu0 %vm298_vm0, %v782_v27  ;;  %2704 = vmatpush3.bf16.xpose.msra.mxu1 %v1419_v53  ;;  %v1372_v58 = vsel %vm298_vm0, %v800_v47, 0  ;;  %v784_v0 = vpack.c.bf16 %v765_v51, %v764_v45  ;;  %v494_v3 = vadd.f32 %v3016_v62, %v493_v63  ;;  %v2588_v4 = vpop.f32.mrb[30].mxu0 }
 0x122   : > { %v673_v1 = vadd.f32 %v2624_v57, %v3011_v61  ;;  %v664_v2 = vpop.f32.mrb[31].mxu1  ;;  %2698 = vmatpush3.bf16.xpose.msra.mxu0 %v1372_v58  ;;  %2705 = vmatprep.mubr.msk.bf16.mxu1 %vm2868_vm1, %v2867_v60  ;;  %v706_v6 = vmax.f32 %v502_v59, 0.0  ;;  %v505_v7 = vadd.f32 %v2588_v4, %v3016_v62  ;;  %v496_v8 = vpop.f32.mrb[31].mxu0  ;;  %v738_v9 = vmax.f32 %v670_v50, 0.0 }
 0x123   : > { %v665_v5 = vadd.f32 %v3011_v61, %v664_v2  ;;  %2699 = vmatprep.mubr.msk.bf16.mxu0 %vm2868_vm1, %v2867_v60  ;;  %2715 = vmatprep.subr.bf16.mxu1 %v2867_v60  ;;  %v704_v11 = vmax.f32 %v494_v3, 0.0  ;;  %v497_v12 = vadd.f32 %v3016_v62, %v496_v8  ;;  %v736_v13 = vmax.f32 %v662_v56, 0.0 }
 0x124   : > { %v739_v10 = vmax.f32 %v673_v1, 0.0  ;;  %2709 = vmatprep.subr.bf16.mxu0 %v2867_v60  ;;  %v770_v15 = vmul.f32 0.17677669, %v706_v6  ;;  %v707_v61 = vmax.f32 %v505_v7, 0.0 }
 0x125   : > { %v737_v14 = vmax.f32 %v665_v5, 0.0  ;;  %v768_v17 = vmul.f32 0.17677669, %v704_v11  ;;  %v705_v18 = vmax.f32 %v497_v12, 0.0 }
 0x126   : > { %v803_v16 = vpack.c.bf16 %v739_v10, %v738_v9  ;;  %v771_v20 = vmul.f32 0.17677669, %v707_v61 }
 0x127   : > { %v802_v19 = vpack.c.bf16 %v737_v14, %v736_v13  ;;  %v769_v21 = vmul.f32 0.17677669, %v705_v18 }
 0x128   : > { %2706 = vmatmul.mubr.msk.bf16.vlgmr.msra.gmra.mrb[56].mxu1 %vm298_vm0, %v785_v55  ;;  %v1513_v22 = vsel %vm298_vm0, %v803_v16, 0  ;;  %v787_v23 = vpack.c.bf16 %v771_v20, %v770_v15 }
 0x129   : > { %2700 = vmatmul.mubr.msk.bf16.vlgmr.msra.gmra.mrb[56].mxu0 %vm298_vm0, %v784_v0  ;;  %2716 = vmatpush3.bf16.xpose.msra.mxu1 %v1513_v22  ;;  %v1466_v62 = vsel %vm298_vm0, %v802_v19, 0  ;;  %v786_v24 = vpack.c.bf16 %v769_v21, %v768_v17 }
 0x12a   : > { %2710 = vmatpush3.bf16.xpose.msra.mxu0 %v1466_v62  ;;  %2717 = vmatprep.mubr.msk.bf16.mxu1 %vm2868_vm1, %v2867_v60 }
 0x12b   : > { %2711 = vmatprep.mubr.msk.bf16.mxu0 %vm2868_vm1, %v2867_v60 }
 0x130   : > { %2718 = vmatmul.mubr.msk.bf16.vlgmr.msra.gmra.mrb[60].mxu1 %vm298_vm0, %v787_v23 }
 0x131   : > { %2712 = vmatmul.mubr.msk.bf16.vlgmr.msra.gmra.mrb[60].mxu0 %vm298_vm0, %v786_v24 }
 0x1cb   : > { %v891_v25 = vpop.f32.mrb[32].mxu1 }
 0x1cc   : > { %v1558_v26 = vsub.f32 0.0, %v891_v25  ;;  %v844_v27 = vpop.f32.mrb[32].mxu0  ;;  %v2635_v28 = vpop.f32.mrb[33].mxu1 }
 0x1cd   : > { %v1556_v29 = vsub.f32 0.0, %v844_v27  ;;  %v2629_v30 = vpop.f32.mrb[33].mxu0  ;;  %v894_v31 = vpop.f32.mrb[34].mxu1 }
 0x1ce   : > { %v1592_v32 = vmul.f32 1.442695, %v1558_v26  ;;  %v1559_v33 = vsub.f32 0.0, %v894_v31  ;;  %v847_v34 = vpop.f32.mrb[34].mxu0  ;;  %v2636_v35 = vpop.f32.mrb[35].mxu1 }
 0x1cf   : > { %v1588_v36 = vmul.f32 1.442695, %v1556_v29  ;;  %v1557_v37 = vsub.f32 0.0, %v847_v34  ;;  %v2630_v38 = vpop.f32.mrb[35].mxu0 }
 0x1d0   : > { %2731 = vpow2.f32 %v1592_v32  ;;  %v1594_v60 = vmul.f32 1.442695, %v1559_v33 }
 0x1d1   : > { %2733 = vpow2.f32 %v1588_v36  ;;  %v1590_v39 = vmul.f32 1.442695, %v1557_v37 }
 0x1d2   : > { %2735 = vpow2.f32 %v1594_v60 }
 0x1d3   : > { %2737 = vpow2.f32 %v1590_v39  ;;  %v985_v40 = vpop.f32.mrb[36].mxu1 }
 0x1d4   : > { %v1562_v41 = vsub.f32 0.0, %v985_v40  ;;  %v938_v42 = vpop.f32.mrb[36].mxu0  ;;  %v2647_v43 = vpop.f32.mrb[37].mxu1 }
 0x1d5   : > { %v1560_v44 = vsub.f32 0.0, %v938_v42  ;;  %v2641_v45 = vpop.f32.mrb[37].mxu0  ;;  %v988_v46 = vpop.f32.mrb[38].mxu1 }
 0x1d6   : > { %v1600_v47 = vmul.f32 1.442695, %v1562_v41  ;;  %v1563_v48 = vsub.f32 0.0, %v988_v46  ;;  %v941_v49 = vpop.f32.mrb[38].mxu0  ;;  %v2648_v50 = vpop.f32.mrb[39].mxu1 }
 0x1d7   : > { %v1596_v51 = vmul.f32 1.442695, %v1560_v44  ;;  %v1561_v52 = vsub.f32 0.0, %v941_v49  ;;  %v2642_v53 = vpop.f32.mrb[39].mxu0 }
 0x1d8   : > { %2739 = vpow2.f32 %v1600_v47  ;;  %v1602_v54 = vmul.f32 1.442695, %v1563_v48 }
 0x1d9   : > { %2741 = vpow2.f32 %v1596_v51  ;;  %v1598_v55 = vmul.f32 1.442695, %v1561_v52 }
 0x1da   : > { %v2732_v56 = vpop.eup %2731  ;;  %2743 = vpow2.f32 %v1602_v54 }
 0x1db   : > { %v2734_v57 = vpop.eup %2733  ;;  %v1654_v58 = vadd.f32 1.0, %v2732_v56  ;;  %2745 = vpow2.f32 %v1598_v55  ;;  %v1079_v59 = vpop.f32.mrb[40].mxu1 }
 0x1dc   : > { %v2736_v63 = vpop.eup %2735  ;;  %v1652_v0 = vadd.f32 1.0, %v2734_v57  ;;  %v1566_v1 = vsub.f32 0.0, %v1079_v59  ;;  %v1032_v2 = vpop.f32.mrb[40].mxu0 }
 0x1dd   : > { %v2659_v3 = vpop.f32.mrb[41].mxu1  ;;  %v2738_v4 = vpop.eup %2737  ;;  %2747 = vrcp.f32 %v1654_v58  ;;  %v1655_v5 = vadd.f32 1.0, %v2736_v63  ;;  %v1564_v6 = vsub.f32 0.0, %v1032_v2 }
 0x1de   : > { %v2653_v7 = vpop.f32.mrb[41].mxu0  ;;  %v1082_v8 = vpop.f32.mrb[42].mxu1  ;;  %2749 = vrcp.f32 %v1652_v0  ;;  %v1653_v9 = vadd.f32 1.0, %v2738_v4  ;;  %v1608_v10 = vmul.f32 1.442695, %v1566_v1 }
 0x1df   : > { %v1567_v11 = vsub.f32 0.0, %v1082_v8  ;;  %v1035_v12 = vpop.f32.mrb[42].mxu0  ;;  %v2660_v13 = vpop.f32.mrb[43].mxu1  ;;  %2751 = vrcp.f32 %v1655_v5  ;;  %v1604_v14 = vmul.f32 1.442695, %v1564_v6 }
 0x1e0   : > { %v1565_v15 = vsub.f32 0.0, %v1035_v12  ;;  %v2654_v61 = vpop.f32.mrb[43].mxu0  ;;  %2753 = vrcp.f32 %v1653_v9 }
 0x1e1   : > { %v1610_v16 = vmul.f32 1.442695, %v1567_v11  ;;  %2755 = vpow2.f32 %v1608_v10 }
 0x1e2   : > { %v1606_v17 = vmul.f32 1.442695, %v1565_v15  ;;  %v2740_v18 = vpop.eup %2739  ;;  %2757 = vpow2.f32 %v1604_v14 }
 0x1e3   : > { %v2742_v19 = vpop.eup %2741  ;;  %v1658_v20 = vadd.f32 1.0, %v2740_v18  ;;  %2759 = vpow2.f32 %v1610_v16  ;;  %v1173_v21 = vpop.f32.mrb[44].mxu1 }
 0x1e4   : > { %v2744_v22 = vpop.eup %2743  ;;  %v1656_v23 = vadd.f32 1.0, %v2742_v19  ;;  %2761 = vpow2.f32 %v1606_v17  ;;  %v1570_v62 = vsub.f32 0.0, %v1173_v21  ;;  %v1126_v24 = vpop.f32.mrb[44].mxu0 }
 0x1e5   : > { %v2671_v25 = vpop.f32.mrb[45].mxu1  ;;  %v2746_v26 = vpop.eup %2745  ;;  %2763 = vrcp.f32 %v1658_v20  ;;  %v1659_v27 = vadd.f32 1.0, %v2744_v22  ;;  %v1568_v28 = vsub.f32 0.0, %v1126_v24 }
 0x1e6   : > { %v2665_v29 = vpop.f32.mrb[45].mxu0  ;;  %v1176_v30 = vpop.f32.mrb[46].mxu1  ;;  %2765 = vrcp.f32 %v1656_v23  ;;  %v1657_v31 = vadd.f32 1.0, %v2746_v26  ;;  %v1616_v32 = vmul.f32 1.442695, %v1570_v62 }
 0x1e7   : > { %v1571_v33 = vsub.f32 0.0, %v1176_v30  ;;  %v1129_v34 = vpop.f32.mrb[46].mxu0  ;;  %v2672_v35 = vpop.f32.mrb[47].mxu1  ;;  %2767 = vrcp.f32 %v1659_v27  ;;  %v1612_v37 = vmul.f32 1.442695, %v1568_v28 }
 0x1e8   : > { %v3156_v36 = vpop.eup %2747  ;;  %v1569_v38 = vsub.f32 0.0, %v1129_v34  ;;  %v2666_v60 = vpop.f32.mrb[47].mxu0  ;;  %2769 = vrcp.f32 %v1657_v31 }
 0x1e9   : > { %v3158_v39 = vpop.eup %2749  ;;  %v1618_v40 = vmul.f32 1.442695, %v1571_v33  ;;  %1748 = vxpose.xlu1.b32.start [1/2] (short) (narrow) %v3156_v36, 16  ;;  %2771 = vpow2.f32 %v1616_v32 }
 0x1ea   : > { %v3161_v41 = vpop.eup %2751  ;;  %v1614_v42 = vmul.f32 1.442695, %v1569_v38  ;;  %1716 = vxpose.xlu0.b32.start [1/2] (short) (narrow) %v3158_v39, 16  ;;  %2773 = vpow2.f32 %v1612_v37 }
 0x1eb   : > { %v3164_v43 = vpop.eup %2753  ;;  %2775 = vpow2.f32 %v1618_v40  ;;  %v1267_v45 = vpop.f32.mrb[48].mxu1 }
 0x1ec   : > { %v2756_v44 = vpop.eup %2755  ;;  %2777 = vpow2.f32 %v1614_v42  ;;  %v1574_v48 = vsub.f32 0.0, %v1267_v45  ;;  %v1220_v49 = vpop.f32.mrb[48].mxu0 }
 0x1ed   : > { %v2758_v46 = vpop.eup %2757  ;;  %v1662_v47 = vadd.f32 1.0, %v2756_v44  ;;  %1749 = vxpose.xlu1.b32.end [2/2] (short) (narrow) %v3161_v41, 16  ;;  %v2683_v50 = vpop.f32.mrb[49].mxu1  ;;  %v1572_v53 = vsub.f32 0.0, %v1220_v49 }
 0x1ee   : > { %v2760_v51 = vpop.eup %2759  ;;  %v1660_v52 = vadd.f32 1.0, %v2758_v46  ;;  %1717 = vxpose.xlu0.b32.end [2/2] (short) (narrow) %v3164_v43, 16  ;;  %v2677_v54 = vpop.f32.mrb[49].mxu0  ;;  %v1624_v58 = vmul.f32 1.442695, %v1574_v48 }
 0x1ef   : > { %v1270_v55 = vpop.f32.mrb[50].mxu1  ;;  %v2762_v56 = vpop.eup %2761  ;;  %2779 = vrcp.f32 %v1662_v47  ;;  %v1663_v57 = vadd.f32 1.0, %v2760_v51  ;;  %v1620_v3 = vmul.f32 1.442695, %v1572_v53 }
 0x1f0   : > { %v1575_v59 = vsub.f32 0.0, %v1270_v55  ;;  %v1223_v63 = vpop.f32.mrb[50].mxu0  ;;  %v2684_v0 = vpop.f32.mrb[51].mxu1  ;;  %2781 = vrcp.f32 %v1660_v52  ;;  %v1661_v2 = vadd.f32 1.0, %v2762_v56 }
 0x1f1   : > { %v3168_v1 = vpop.eup %2763  ;;  %v1573_v4 = vsub.f32 0.0, %v1223_v63  ;;  %v2678_v5 = vpop.f32.mrb[51].mxu0  ;;  %2783 = vrcp.f32 %v1663_v57 }
 0x1f2   : > { %v3170_v6 = vpop.eup %2765  ;;  %v1626_v7 = vmul.f32 1.442695, %v1575_v59  ;;  %1812 = vxpose.xlu1.b32.start [1/2] (short) (narrow) %v3168_v1, 16  ;;  %2785 = vrcp.f32 %v1661_v2 }
 0x1f3   : > { %v3173_v8 = vpop.eup %2767  ;;  %v1622_v9 = vmul.f32 1.442695, %v1573_v4  ;;  %1780 = vxpose.xlu0.b32.start [1/2] (short) (narrow) %v3170_v6, 16  ;;  %2787 = vpow2.f32 %v1624_v58  ;;  %v1361_v12 = vpop.f32.mrb[52].mxu1 }
 0x1f4   : > { %v3176_v10 = vpop.eup %2769  ;;  %2789 = vpow2.f32 %v1620_v3  ;;  %v1578_v15 = vsub.f32 0.0, %v1361_v12  ;;  %v1314_v61 = vpop.f32.mrb[52].mxu0 }
 0x1f5   : > { %v2772_v11 = vpop.eup %2771  ;;  %2791 = vpow2.f32 %v1626_v7  ;;  %v2695_v16 = vpop.f32.mrb[53].mxu1  ;;  %v1576_v19 = vsub.f32 0.0, %v1314_v61 }
 0x1f6   : > { %v2774_v13 = vpop.eup %2773  ;;  %v1666_v14 = vadd.f32 1.0, %v2772_v11  ;;  %1813 = vxpose.xlu1.b32.end [2/2] (short) (narrow) %v3173_v8, 16  ;;  %2793 = vpow2.f32 %v1622_v9  ;;  %v2689_v20 = vpop.f32.mrb[53].mxu0  ;;  %v1632_v62 = vmul.f32 1.442695, %v1578_v15 }
 0x1f7   : > { %v2776_v17 = vpop.eup %2775  ;;  %v1664_v18 = vadd.f32 1.0, %v2774_v13  ;;  %1781 = vxpose.xlu0.b32.end [2/2] (short) (narrow) %v3176_v10, 16  ;;  %v1364_v21 = vpop.f32.mrb[54].mxu1  ;;  %v1628_v28 = vmul.f32 1.442695, %v1576_v19 }
 0x1f8   : > { %v2778_v22 = vpop.eup %2777  ;;  %2795 = vrcp.f32 %v1666_v14  ;;  %v1667_v23 = vadd.f32 1.0, %v2776_v17  ;;  %v1579_v24 = vsub.f32 0.0, %v1364_v21  ;;  %v1317_v25 = vpop.f32.mrb[54].mxu0 }
 0x1f9   : > { %v2696_v26 = vpop.f32.mrb[55].mxu1  ;;  %2797 = vrcp.f32 %v1664_v18  ;;  %v1665_v27 = vadd.f32 1.0, %v2778_v22  ;;  %v1577_v29 = vsub.f32 0.0, %v1317_v25  ;;  %v2690_v30 = vpop.f32.mrb[55].mxu0 }
 0x1fa   : > { %v3180_v31 = vpop.eup %2779  ;;  %2799 = vrcp.f32 %v1667_v23  ;;  %v1634_v32 = vmul.f32 1.442695, %v1579_v24 }
 0x1fb   : > { %v3182_v33 = vpop.eup %2781  ;;  %2801 = vrcp.f32 %v1665_v27  ;;  %1876 = vxpose.xlu1.b32.start [1/2] (short) (narrow) %v3180_v31, 16  ;;  %v1630_v34 = vmul.f32 1.442695, %v1577_v29  ;;  %v1455_v38 = vpop.f32.mrb[56].mxu1 }
 0x1fc   : > { %v3185_v35 = vpop.eup %2783  ;;  %2803 = vpow2.f32 %v1632_v62  ;;  %1844 = vxpose.xlu0.b32.start [1/2] (short) (narrow) %v3182_v33, 16  ;;  %v1582_v40 = vsub.f32 0.0, %v1455_v38  ;;  %v1408_v42 = vpop.f32.mrb[56].mxu0 }
 0x1fd   : > { %v3188_v37 = vpop.eup %2785  ;;  %2805 = vpow2.f32 %v1628_v28  ;;  %v2707_v44 = vpop.f32.mrb[57].mxu1  ;;  %v1580_v47 = vsub.f32 0.0, %v1408_v42 }
 0x1fe   : > { %v2788_v60 = vpop.eup %2787  ;;  %2807 = vpow2.f32 %v1634_v32  ;;  %v2701_v48 = vpop.f32.mrb[57].mxu0  ;;  %v1640_v56 = vmul.f32 1.442695, %v1582_v40 }
 0x1ff   : > { %v2790_v45 = vpop.eup %2789  ;;  %v1670_v46 = vadd.f32 1.0, %v2788_v60  ;;  %2809 = vpow2.f32 %v1630_v34  ;;  %1877 = vxpose.xlu1.b32.end [2/2] (short) (narrow) %v3185_v35, 16  ;;  %v1458_v49 = vpop.f32.mrb[58].mxu1  ;;  %v1636_v2 = vmul.f32 1.442695, %v1580_v47 }
 0x200   : > { %v2792_v50 = vpop.eup %2791  ;;  %v1668_v51 = vadd.f32 1.0, %v2790_v45  ;;  %1845 = vxpose.xlu0.b32.end [2/2] (short) (narrow) %v3188_v37, 16  ;;  %v1583_v52 = vsub.f32 0.0, %v1458_v49  ;;  %v1411_v53 = vpop.f32.mrb[58].mxu0 }
 0x201   : > { %v2794_v54 = vpop.eup %2793  ;;  %2811 = vrcp.f32 %v1670_v46  ;;  %v1671_v55 = vadd.f32 1.0, %v2792_v50  ;;  %v1581_v57 = vsub.f32 0.0, %v1411_v53  ;;  %v2708_v58 = vpop.f32.mrb[59].mxu1 }
 0x202   : > { %v2702_v59 = vpop.f32.mrb[59].mxu0  ;;  %v3192_v63 = vpop.eup %2795  ;;  %2813 = vrcp.f32 %v1668_v51  ;;  %v1669_v0 = vadd.f32 1.0, %v2794_v54  ;;  %v1642_v4 = vmul.f32 1.442695, %v1583_v52 }
 0x203   : > { %v3194_v3 = vpop.eup %2797  ;;  %2815 = vrcp.f32 %v1671_v55  ;;  %1940 = vxpose.xlu1.b32.start [1/2] (short) (narrow) %v3192_v63, 16  ;;  %v1638_v7 = vmul.f32 1.442695, %v1581_v57  ;;  %v1549_v11 = vpop.f32.mrb[60].mxu1 }
 0x204   : > { %v3197_v5 = vpop.eup %2799  ;;  %2817 = vrcp.f32 %v1669_v0  ;;  %1908 = vxpose.xlu0.b32.start [1/2] (short) (narrow) %v3194_v3, 16  ;;  %v1586_v13 = vsub.f32 0.0, %v1549_v11  ;;  %v1502_v14 = vpop.f32.mrb[60].mxu0 }
 0x205   : > { %v3200_v9 = vpop.eup %2801  ;;  %2819 = vpow2.f32 %v1640_v56  ;;  %v2719_v15 = vpop.f32.mrb[61].mxu1  ;;  %v1584_v17 = vsub.f32 0.0, %v1502_v14 }
 0x206   : > { %v2804_v12 = vpop.eup %2803  ;;  %2821 = vpow2.f32 %v1636_v2  ;;  %v2713_v18 = vpop.f32.mrb[61].mxu0  ;;  %v1648_v25 = vmul.f32 1.442695, %v1586_v13 }
 0x207   : > { %v2806_v61 = vpop.eup %2805  ;;  %v1674_v16 = vadd.f32 1.0, %v2804_v12  ;;  %2823 = vpow2.f32 %v1642_v4  ;;  %1941 = vxpose.xlu1.b32.end [2/2] (short) (narrow) %v3197_v5, 16  ;;  %v1552_v19 = vpop.f32.mrb[62].mxu1  ;;  %v1644_v30 = vmul.f32 1.442695, %v1584_v17  ;;  %v2292_v18 = vlaneseq }
 0x208   : > { %v2808_v20 = vpop.eup %2807  ;;  %v1672_v21 = vadd.f32 1.0, %v2806_v61  ;;  %2825 = vpow2.f32 %v1638_v7  ;;  %1909 = vxpose.xlu0.b32.end [2/2] (short) (narrow) %v3200_v9, 16  ;;  %v1587_v22 = vsub.f32 0.0, %v1552_v19  ;;  %v1505_v23 = vpop.f32.mrb[62].mxu0 }
 0x209   : > { %v2810_v62 = vpop.eup %2809  ;;  %2827 = vrcp.f32 %v1674_v16  ;;  %v1675_v24 = vadd.f32 1.0, %v2808_v20  ;;  %v1585_v26 = vsub.f32 0.0, %v1505_v23  ;;  %v2714_v27 = vpop.f32.mrb[63].mxu0  ;;  %v2293_v19 = vshrl.u32 %v2292_v18, 7 }
 0x20a   : > { %v2720_v28 = vpop.f32.mrb[63].mxu1  ;;  %2829 = vrcp.f32 %v1672_v21  ;;  %v1673_v29 = vadd.f32 1.0, %v2810_v62  ;;  %v1650_v34 = vmul.f32 1.442695, %v1587_v22  ;;  %v2296_v20 = vand.u32 127, %v2292_v18 }
 0x20b   : > { %v3204_v32 = vpop.eup %2811  ;;  %2831 = vrcp.f32 %v1675_v24  ;;  %v1646_v60 = vmul.f32 1.442695, %v1585_v26 }
 0x20c   : > { %v3206_v38 = vpop.eup %2813  ;;  %2833 = vrcp.f32 %v1673_v29  ;;  %2004 = vxpose.xlu1.b32.start [1/2] (short) (narrow) %v3204_v32, 16  ;;  %vm3255_vm2 = vcmp.eq.s32.totalorder %v2293_v19, %v2296_v20 }
 0x20d   : > { %v3209_v40 = vpop.eup %2815  ;;  %2835 = vpow2.f32 %v1648_v25  ;;  %1972 = vxpose.xlu0.b32.start [1/2] (short) (narrow) %v3206_v38, 16  ;;  %v2294_v25 = vadd.s32 8, %v2293_v19 }
 0x20e   : > { %v3212_v42 = vpop.eup %2817  ;;  %2837 = vpow2.f32 %v1644_v30 }
 0x20f   : > { %v2820_v44 = vpop.eup %2819  ;;  %2839 = vpow2.f32 %v1650_v34  ;;  %vm3272_vm4 = vcmp.eq.s32.totalorder %v2294_v25, %v2296_v20 }
 0x210   : > { %v2822_v45 = vpop.eup %2821  ;;  %v1678_v46 = vadd.f32 1.0, %v2820_v44  ;;  %2841 = vpow2.f32 %v1646_v60  ;;  %2005 = vxpose.xlu1.b32.end [2/2] (short) (narrow) %v3209_v40, 16 }
 0x211   : > { %v2824_v47 = vpop.eup %2823  ;;  %v1676_v48 = vadd.f32 1.0, %v2822_v45  ;;  %1973 = vxpose.xlu0.b32.end [2/2] (short) (narrow) %v3212_v42, 16 }
 0x212   : > { %v2826_v49 = vpop.eup %2825  ;;  %2843 = vrcp.f32 %v1678_v46  ;;  %v1679_v50 = vadd.f32 1.0, %v2824_v47 }
 0x213   : > { %v3216_v51 = vpop.eup %2827  ;;  %2845 = vrcp.f32 %v1676_v48  ;;  %v1677_v52 = vadd.f32 1.0, %v2826_v49 }
 0x214   : > { %v3218_v53 = vpop.eup %2829  ;;  %2068 = vxpose.xlu1.b32.start [1/2] (short) (narrow) %v3216_v51, 16  ;;  %2847 = vrcp.f32 %v1679_v50 }
 0x215   : > { %v3221_v54 = vpop.eup %2831  ;;  %2036 = vxpose.xlu0.b32.start [1/2] (short) (narrow) %v3218_v53, 16  ;;  %2849 = vrcp.f32 %v1677_v52 }
 0x216   : > { %v3224_v55 = vpop.eup %2833 }
 0x217   : > { %v2836_v56 = vpop.eup %2835 }
 0x218   : > { %v2838_v57 = vpop.eup %2837  ;;  %v1682_v58 = vadd.f32 1.0, %v2836_v56  ;;  %2069 = vxpose.xlu1.b32.end [2/2] (short) (narrow) %v3221_v54, 16 }
 0x219   : > { %v2840_v59 = vpop.eup %2839  ;;  %v1680_v0 = vadd.f32 1.0, %v2838_v57  ;;  %2037 = vxpose.xlu0.b32.end [2/2] (short) (narrow) %v3224_v55, 16 }
 0x21a   : > { %v2842_v2 = vpop.eup %2841  ;;  %2851 = vrcp.f32 %v1682_v58  ;;  %v1683_v4 = vadd.f32 1.0, %v2840_v59 }
 0x21b   : > { %2853 = vrcp.f32 %v1680_v0  ;;  %v1681_v7 = vadd.f32 1.0, %v2842_v2 }
 0x21c   : > { %v3228_v11 = vpop.eup %2843  ;;  %2855 = vrcp.f32 %v1683_v4 }
 0x21d   : > { %v3230_v12 = vpop.eup %2845  ;;  %2132 = vxpose.xlu1.b32.start [1/2] (short) (narrow) %v3228_v11, 16  ;;  %2857 = vrcp.f32 %v1681_v7 }
 0x21e   : > { %2100 = vxpose.xlu0.b32.start [1/2] (short) (narrow) %v3230_v12, 16  ;;  %v3234_v13 = vpop.eup %2847 }
 0x21f   : > { %v3236_v14 = vpop.eup %2849 }
 0x221   : > { %2133 = vxpose.xlu1.b32.end [2/2] (short) (narrow) %v3234_v13, 16 }
 0x222   : > { %2101 = vxpose.xlu0.b32.end [2/2] (short) (narrow) %v3236_v14, 16 }
 0x224   : > { %v3240_v15 = vpop.eup %2851 }
 0x225   : > { %v3242_v61 = vpop.eup %2853  ;;  %2196 = vxpose.xlu1.b32.start [1/2] (short) (narrow) %v3240_v15, 16 }
 0x226   : > { %2164 = vxpose.xlu0.b32.start [1/2] (short) (narrow) %v3242_v61, 16  ;;  %v3246_v16 = vpop.eup %2855 }
 0x227   : > { %v3248_v17 = vpop.eup %2857 }
 0x229   : > { %2197 = vxpose.xlu1.b32.end [2/2] (short) (narrow) %v3246_v16, 16 }
 0x22a   : > { %2165 = vxpose.xlu0.b32.end [2/2] (short) (narrow) %v3248_v17, 16 }
 0x269   : > { %v1764_v21 = vpop.trf.xlu1 }
 0x26a   : > { %v2230_v22 = vadd.f32 %v3156_v36, %v1764_v21  ;;  %v1732_v23 = vpop.trf.xlu0 }
 0x26b   : > { %v2228_v24 = vadd.f32 %v3158_v39, %v1732_v23 }
 0x26c   : > { %v2262_v26 = vmul.f32 0.5, %v2230_v22 }
 0x26d   : > { %v2260_v27 = vmul.f32 0.5, %v2228_v24  ;;  %v1765_v36 = vpop.trf.xlu1 }
 0x26e   : > { %v2301_v28 = vsel %vm3255_vm2, 0.0, %v2262_v26  ;;  %v2231_v29 = vadd.f32 %v3161_v41, %v1765_v36  ;;  %v1733_v39 = vpop.trf.xlu0 }
 0x26f   : > { %2334 = vst.msk [vmem:[%s3263_s19 + $0x10] sm:$0xff] %vm2331_vm3, %v2301_v28  ;;  %v2299_v30 = vsel %vm3255_vm2, 0.0, %v2260_v27  ;;  %v2229_v60 = vadd.f32 %v3164_v43, %v1733_v39 }
 0x270   : > { %2332 = vst.msk [vmem:[%s3263_s19] sm:$0xff] %vm2331_vm3, %v2299_v30  ;;  %v2263_v44 = vmul.f32 0.5, %v2231_v29 }
 0x271   : > { %v2261_v45 = vmul.f32 0.5, %v2229_v60 }
 0x272   : > { %v1828_v46 = vpop.trf.xlu1  ;;  %v2302_v41 = vsel %vm3272_vm4, 0.0, %v2263_v44 }
 0x273   : > { %v2234_v47 = vadd.f32 %v3168_v1, %v1828_v46  ;;  %v1796_v48 = vpop.trf.xlu0  ;;  %2335 = vst.msk [vmem:[%s3263_s19 + $0x18] sm:$0xff] %vm2331_vm3, %v2302_v41  ;;  %v2300_v49 = vsel %vm3272_vm4, 0.0, %v2261_v45 }
 0x274   : > { %v2232_v43 = vadd.f32 %v3170_v6, %v1796_v48  ;;  %2333 = vst.msk [vmem:[%s3263_s19 + $0x8] sm:$0xff] %vm2331_vm3, %v2300_v49 }
 0x275   : > { %v2266_v50 = vmul.f32 0.5, %v2234_v47 }
 0x276   : > { %v2264_v52 = vmul.f32 0.5, %v2232_v43  ;;  %v1829_v56 = vpop.trf.xlu1 }
 0x277   : > { %v2305_v57 = vsel %vm3255_vm2, 0.0, %v2266_v50  ;;  %v2235_v1 = vadd.f32 %v3173_v8, %v1829_v56  ;;  %v1797_v58 = vpop.trf.xlu0 }
 0x278   : > { %2338 = vst.msk [vmem:[%s3263_s19 + $0x30] sm:$0xff] %vm2331_vm3, %v2305_v57  ;;  %v2303_v59 = vsel %vm3255_vm2, 0.0, %v2264_v52  ;;  %v2233_v6 = vadd.f32 %v3176_v10, %v1797_v58 }
 0x279   : > { %2336 = vst.msk [vmem:[%s3263_s19 + $0x20] sm:$0xff] %vm2331_vm3, %v2303_v59  ;;  %v2267_v0 = vmul.f32 0.5, %v2235_v1 }
 0x27a   : > { %v2265_v2 = vmul.f32 0.5, %v2233_v6 }
 0x27b   : > { %v2306_v4 = vsel %vm3272_vm4, 0.0, %v2267_v0  ;;  %v1892_v7 = vpop.trf.xlu1 }
 0x27c   : > { %2339 = vst.msk [vmem:[%s3263_s19 + $0x38] sm:$0xff] %vm2331_vm3, %v2306_v4  ;;  %v2304_v8 = vsel %vm3272_vm4, 0.0, %v2265_v2  ;;  %v2238_v18 = vadd.f32 %v3180_v31, %v1892_v7  ;;  %v1860_v19 = vpop.trf.xlu0 }
 0x27d   : > { %2337 = vst.msk [vmem:[%s3263_s19 + $0x28] sm:$0xff] %vm2331_vm3, %v2304_v8  ;;  %v2236_v10 = vadd.f32 %v3182_v33, %v1860_v19 }
 0x27e   : > { %v2270_v20 = vmul.f32 0.5, %v2238_v18 }
 0x27f   : > { %v2268_v21 = vmul.f32 0.5, %v2236_v10  ;;  %v1893_v22 = vpop.trf.xlu1 }
 0x280   : > { %v2309_v23 = vsel %vm3255_vm2, 0.0, %v2270_v20  ;;  %v2239_v24 = vadd.f32 %v3185_v35, %v1893_v22  ;;  %v1861_v25 = vpop.trf.xlu0 }
 0x281   : > { %2342 = vst.msk [vmem:[%s3263_s19 + $0x50] sm:$0xff] %vm2331_vm3, %v2309_v23  ;;  %v2307_v31 = vsel %vm3255_vm2, 0.0, %v2268_v21  ;;  %v2237_v26 = vadd.f32 %v3188_v37, %v1861_v25 }
 0x282   : > { %2340 = vst.msk [vmem:[%s3263_s19 + $0x40] sm:$0xff] %vm2331_vm3, %v2307_v31  ;;  %v2271_v33 = vmul.f32 0.5, %v2239_v24 }
 0x283   : > { %v2269_v27 = vmul.f32 0.5, %v2237_v26  ;;  %v1956_v36 = vpop.trf.xlu1 }
 0x284   : > { %v2310_v28 = vsel %vm3272_vm4, 0.0, %v2271_v33  ;;  %v2242_v35 = vadd.f32 %v3192_v63, %v1956_v36  ;;  %v1924_v29 = vpop.trf.xlu0 }
 0x285   : > { %2343 = vst.msk [vmem:[%s3263_s19 + $0x58] sm:$0xff] %vm2331_vm3, %v2310_v28  ;;  %v2308_v39 = vsel %vm3272_vm4, 0.0, %v2269_v27  ;;  %v2240_v37 = vadd.f32 %v3194_v3, %v1924_v29 }
 0x286   : > { %2341 = vst.msk [vmem:[%s3263_s19 + $0x48] sm:$0xff] %vm2331_vm3, %v2308_v39  ;;  %v2274_v30 = vmul.f32 0.5, %v2242_v35 }
 0x287   : > { %v2272_v60 = vmul.f32 0.5, %v2240_v37  ;;  %v1957_v44 = vpop.trf.xlu1 }
 0x288   : > { %v2313_v45 = vsel %vm3255_vm2, 0.0, %v2274_v30  ;;  %v2243_v63 = vadd.f32 %v3197_v5, %v1957_v44  ;;  %v1925_v46 = vpop.trf.xlu0 }
 0x289   : > { %2346 = vst.msk [vmem:[%s3263_s19 + $0x70] sm:$0xff] %vm2331_vm3, %v2313_v45  ;;  %v2311_v41 = vsel %vm3255_vm2, 0.0, %v2272_v60  ;;  %v2241_v3 = vadd.f32 %v3200_v9, %v1925_v46 }
 0x28a   : > { %2344 = vst.msk [vmem:[%s3263_s19 + $0x60] sm:$0xff] %vm2331_vm3, %v2311_v41  ;;  %v2275_v47 = vmul.f32 0.5, %v2243_v63 }
 0x28b   : > { %v2273_v48 = vmul.f32 0.5, %v2241_v3 }
 0x28c   : > { %v2314_v49 = vsel %vm3272_vm4, 0.0, %v2275_v47  ;;  %v2020_v43 = vpop.trf.xlu1 }
 0x28d   : > { %2347 = vst.msk [vmem:[%s3263_s19 + $0x78] sm:$0xff] %vm2331_vm3, %v2314_v49  ;;  %v2312_v5 = vsel %vm3272_vm4, 0.0, %v2273_v48  ;;  %v2246_v50 = vadd.f32 %v3204_v32, %v2020_v43  ;;  %v1988_v52 = vpop.trf.xlu0 }
 0x28e   : > { %2345 = vst.msk [vmem:[%s3263_s19 + $0x68] sm:$0xff] %vm2331_vm3, %v2312_v5  ;;  %v2244_v9 = vadd.f32 %v3206_v38, %v1988_v52 }
 0x28f   : > { %v2278_v56 = vmul.f32 0.5, %v2246_v50 }
 0x290   : > { %v2276_v57 = vmul.f32 0.5, %v2244_v9  ;;  %v2021_v1 = vpop.trf.xlu1 }
 0x291   : > { %v2317_v58 = vsel %vm3255_vm2, 0.0, %v2278_v56  ;;  %v2247_v59 = vadd.f32 %v3209_v40, %v2021_v1  ;;  %v1989_v6 = vpop.trf.xlu0 }
 0x292   : > { %2350 = vst.msk [vmem:[%s3263_s19 + $0x90] sm:$0xff] %vm2331_vm3, %v2317_v58  ;;  %v2315_v32 = vsel %vm3255_vm2, 0.0, %v2276_v57  ;;  %v2245_v0 = vadd.f32 %v3212_v42, %v1989_v6 }
 0x293   : > { %2348 = vst.msk [vmem:[%s3263_s19 + $0x80] sm:$0xff] %vm2331_vm3, %v2315_v32  ;;  %v2279_v38 = vmul.f32 0.5, %v2247_v59 }
 0x294   : > { %v2277_v2 = vmul.f32 0.5, %v2245_v0  ;;  %v2084_v4 = vpop.trf.xlu1 }
 0x295   : > { %v2318_v7 = vsel %vm3272_vm4, 0.0, %v2279_v38  ;;  %v2250_v40 = vadd.f32 %v3216_v51, %v2084_v4  ;;  %v2052_v8 = vpop.trf.xlu0 }
 0x296   : > { %2351 = vst.msk [vmem:[%s3263_s19 + $0x98] sm:$0xff] %vm2331_vm3, %v2318_v7  ;;  %v2316_v18 = vsel %vm3272_vm4, 0.0, %v2277_v2  ;;  %v2248_v42 = vadd.f32 %v3218_v53, %v2052_v8 }
 0x297   : > { %2349 = vst.msk [vmem:[%s3263_s19 + $0x88] sm:$0xff] %vm2331_vm3, %v2316_v18  ;;  %v2282_v19 = vmul.f32 0.5, %v2250_v40 }
 0x298   : > { %v2280_v10 = vmul.f32 0.5, %v2248_v42  ;;  %v2085_v20 = vpop.trf.xlu1 }
 0x299   : > { %v2321_v21 = vsel %vm3255_vm2, 0.0, %v2282_v19  ;;  %v2251_v51 = vadd.f32 %v3221_v54, %v2085_v20  ;;  %v2053_v22 = vpop.trf.xlu0 }
 0x29a   : > { %2354 = vst.msk [vmem:[%s3263_s19 + $0xb0] sm:$0xff] %vm2331_vm3, %v2321_v21  ;;  %v2319_v23 = vsel %vm3255_vm2, 0.0, %v2280_v10  ;;  %v2249_v53 = vadd.f32 %v3224_v55, %v2053_v22 }
 0x29b   : > { %2352 = vst.msk [vmem:[%s3263_s19 + $0xa0] sm:$0xff] %vm2331_vm3, %v2319_v23  ;;  %v2283_v24 = vmul.f32 0.5, %v2251_v51 }
 0x29c   : > { %v2281_v25 = vmul.f32 0.5, %v2249_v53 }
 0x29d   : > { %v2322_v31 = vsel %vm3272_vm4, 0.0, %v2283_v24  ;;  %v2148_v26 = vpop.trf.xlu1 }
 0x29e   : > { %2355 = vst.msk [vmem:[%s3263_s19 + $0xb8] sm:$0xff] %vm2331_vm3, %v2322_v31  ;;  %v2320_v54 = vsel %vm3272_vm4, 0.0, %v2281_v25  ;;  %v2254_v33 = vadd.f32 %v3228_v11, %v2148_v26  ;;  %v2116_v27 = vpop.trf.xlu0 }
 0x29f   : > { %2353 = vst.msk [vmem:[%s3263_s19 + $0xa8] sm:$0xff] %vm2331_vm3, %v2320_v54  ;;  %v2252_v55 = vadd.f32 %v3230_v12, %v2116_v27 }
 0x2a0   : > { %v2286_v36 = vmul.f32 0.5, %v2254_v33 }
 0x2a1   : > { %v2284_v28 = vmul.f32 0.5, %v2252_v55  ;;  %v2149_v35 = vpop.trf.xlu1 }
 0x2a2   : > { %v2325_v29 = vsel %vm3255_vm2, 0.0, %v2286_v36  ;;  %v2255_v39 = vadd.f32 %v3234_v13, %v2149_v35  ;;  %v2117_v37 = vpop.trf.xlu0 }
 0x2a3   : > { %2358 = vst.msk [vmem:[%s3263_s19 + $0xd0] sm:$0xff] %vm2331_vm3, %v2325_v29  ;;  %v2323_v11 = vsel %vm3255_vm2, 0.0, %v2284_v28  ;;  %v2253_v30 = vadd.f32 %v3236_v14, %v2117_v37 }
 0x2a4   : > { %2356 = vst.msk [vmem:[%s3263_s19 + $0xc0] sm:$0xff] %vm2331_vm3, %v2323_v11  ;;  %v2287_v12 = vmul.f32 0.5, %v2255_v39 }
 0x2a5   : > { %v2285_v60 = vmul.f32 0.5, %v2253_v30  ;;  %v2212_v44 = vpop.trf.xlu1 }
 0x2a6   : > { %v2326_v45 = vsel %vm3272_vm4, 0.0, %v2287_v12  ;;  %v2258_v13 = vadd.f32 %v3240_v15, %v2212_v44  ;;  %v2180_v63 = vpop.trf.xlu0 }
 0x2a7   : > { %2359 = vst.msk [vmem:[%s3263_s19 + $0xd8] sm:$0xff] %vm2331_vm3, %v2326_v45  ;;  %v2324_v46 = vsel %vm3272_vm4, 0.0, %v2285_v60  ;;  %v2256_v14 = vadd.f32 %v3242_v61, %v2180_v63 }
 0x2a8   : > { %2357 = vst.msk [vmem:[%s3263_s19 + $0xc8] sm:$0xff] %vm2331_vm3, %v2324_v46  ;;  %v2290_v41 = vmul.f32 0.5, %v2258_v13 }
 0x2a9   : > { %v2288_v3 = vmul.f32 0.5, %v2256_v14  ;;  %v2213_v47 = vpop.trf.xlu1 }
 0x2aa   : > { %v2329_v48 = vsel %vm3255_vm2, 0.0, %v2290_v41  ;;  %v2259_v15 = vadd.f32 %v3246_v16, %v2213_v47  ;;  %v2181_v49 = vpop.trf.xlu0 }
 0x2ab   : > { %2362 = vst.msk [vmem:[%s3263_s19 + $0xf0] sm:$0xff] %vm2331_vm3, %v2329_v48  ;;  %v2327_v43 = vsel %vm3255_vm2, 0.0, %v2288_v3  ;;  %v2257_v5 = vadd.f32 %v3248_v17, %v2181_v49 }
 0x2ac   : > { %2360 = vst.msk [vmem:[%s3263_s19 + $0xe0] sm:$0xff] %vm2331_vm3, %v2327_v43  ;;  %v2291_v61 = vmul.f32 0.5, %v2259_v15 }
 0x2ad   : > { %v2289_v50 = vmul.f32 0.5, %v2257_v5 }
 0x2ae   : > { %v2330_v52 = vsel %vm3272_vm4, 0.0, %v2291_v61 }
 0x2af   : > { %2363 = vst.msk [vmem:[%s3263_s19 + $0xf8] sm:$0xff] %vm2331_vm3, %v2330_v52  ;;  %v2328_v16 = vsel %vm3272_vm4, 0.0, %v2289_v50 }
 0x2b0   : > { %2361 = vst.msk [vmem:[%s3263_s19 + $0xe8] sm:$0xff] %vm2331_vm3, %v2328_v16 }
 0x2b1 PF: > { %s15_s18 = sadd.s32 1, %s2865_s18  }
 0x2b2   : > { %p12_p5 = scmp.ge.s32.totalorder %s15_s18, 4  }
 0x2b4   :  { %14 = sbr.rel (!%p12_p5) target bundleno = 1 (0x1), region = 70 }

</bundles_post_ra>
